<compile_context>
chip_gen: v7x
topology: tpu7x:2x2x1
jax: 0.10.0
libtpu: 0.0.40
codegen_flags: <defaults>
</compile_context>

<pallas_src>
import functools
import math

import jax
import jax.numpy as jnp
from jax import lax
from jax.experimental import pallas as pl
from jax.experimental.pallas import tpu as pltpu


def block_kernel(x_ref,
                 ln1_g_ref, ln1_b_ref,
                 w_qkv_ref, b_qkv_ref,
                 w_proj_ref, b_proj_ref,
                 ln2_g_ref, ln2_b_ref,
                 w1_ref, b1_ref, w2_ref, b2_ref,
                 out_ref,
                 *, n_head, eps=1e-5):
    f32 = jnp.float32
    bf16 = jnp.bfloat16

    x = x_ref[0]                         # (T, C) for the current batch element, f32
    T, C = x.shape
    hd = C // n_head
    scale = 1.0 / math.sqrt(hd)

    def layernorm(h, g, b):
        mu = jnp.mean(h, axis=-1, keepdims=True)
        var = jnp.mean(jnp.square(h - mu), axis=-1, keepdims=True)
        return (h - mu) * lax.rsqrt(var + eps) * g + b

    # ---------------- attention branch ----------------
    h = layernorm(x, ln1_g_ref[...], ln1_b_ref[...])                       # f32

    # Fused QKV projection: single (T,C)x(C,3C) matmul, bf16 operands, f32 accumulation.
    qkv = jnp.dot(h.astype(bf16), w_qkv_ref[...],
                  preferred_element_type=f32) + b_qkv_ref[...]             # (T, 3C) f32

    # Head-major (n_head, T, hd) tensors built by stacking static column slices
    # (no per-head matmuls; the contractions below are batched over heads).
    def split_heads(m):                                                    # m: (T, C)
        return jnp.stack([m[:, i * hd:(i + 1) * hd] for i in range(n_head)], axis=0)

    qh = split_heads(qkv[:, 0 * C:1 * C]) * scale                          # fold 1/sqrt(hd) into q
    kh = split_heads(qkv[:, 1 * C:2 * C])
    vh = split_heads(qkv[:, 2 * C:3 * C])

    # Batched attention scores for all heads at once.
    att = jnp.einsum('hqd,hkd->hqk', qh.astype(bf16), kh.astype(bf16),
                     preferred_element_type=f32)                           # (H, T, T) f32

    # Causal mask (lower triangular), 2-D iota broadcast over the head dim.
    row = lax.broadcasted_iota(jnp.int32, (T, T), 0)
    col = lax.broadcasted_iota(jnp.int32, (T, T), 1)
    causal = (row >= col)[None, :, :]
    att = jnp.where(causal, att, -1e30)

    # Softmax in f32; divide replaced by approximate reciprocal (EUP).
    m = jnp.max(att, axis=-1, keepdims=True)
    e = jnp.exp(att - m)
    s = jnp.sum(e, axis=-1, keepdims=True)
    p = e * pl.reciprocal(s, approx=True)

    # Batched P @ V over all heads, then merge heads back to (T, C).
    y = jnp.einsum('hqk,hkd->hqd', p.astype(bf16), vh.astype(bf16),
                   preferred_element_type=f32)                             # (H, T, hd)
    y = jnp.concatenate([y[i] for i in range(n_head)], axis=-1)            # (T, C)

    attn_out = jnp.dot(y.astype(bf16), w_proj_ref[...],
                       preferred_element_type=f32) + b_proj_ref[...]
    x1 = x + attn_out                                                      # residual 1

    # ---------------- MLP branch ----------------
    h2 = layernorm(x1, ln2_g_ref[...], ln2_b_ref[...])
    hmid = jnp.dot(h2.astype(bf16), w1_ref[...],
                   preferred_element_type=f32) + b1_ref[...]
    # exact erf-based GELU (matches torch.nn.GELU default)
    hmid = 0.5 * hmid * (1.0 + lax.erf(hmid * (1.0 / math.sqrt(2.0))))
    mlp_out = jnp.dot(hmid.astype(bf16), w2_ref[...],
                      preferred_element_type=f32) + b2_ref[...]

    out_ref[0] = (x1 + mlp_out).astype(out_ref.dtype)                      # residual 2


def transformer_block(x, params, n_head):
    B, T, C = x.shape
    f32, bf16 = jnp.float32, jnp.bfloat16

    # Fuse Q/K/V weights & biases; pre-cast MXU weights to bf16 (halves resident VMEM).
    w_qkv = jnp.concatenate([params["wq"], params["wk"], params["wv"]], axis=1).astype(bf16)
    b_qkv = jnp.concatenate([params["bq"], params["bk"], params["bv"]], axis=1).astype(f32)

    param_list = [
        params["ln1_g"].astype(f32), params["ln1_b"].astype(f32),
        w_qkv, b_qkv,
        params["wproj"].astype(bf16), params["bproj"].astype(f32),
        params["ln2_g"].astype(f32), params["ln2_b"].astype(f32),
        params["w1"].astype(bf16), params["b1"].astype(f32),
        params["w2"].astype(bf16), params["b2"].astype(f32),
    ]

    in_specs = [pl.BlockSpec((1, T, C), lambda b: (b, 0, 0))]
    for p in param_list:
        nd = p.ndim
        # TODO(synk): these grid-invariant weights get the default double-buffered BlockSpec;
        # single-buffering (pipeline_mode=pl.Buffered(1)) would halve their VMEM footprint.
        in_specs.append(pl.BlockSpec(p.shape, lambda b, n=nd: (0,) * n))

    kernel = functools.partial(block_kernel, n_head=n_head)

    return pl.pallas_call(
        kernel,
        out_shape=jax.ShapeDtypeStruct((B, T, C), x.dtype),
        grid_spec=pltpu.PrefetchScalarGridSpec(
            num_scalar_prefetch=0,
            grid=(B,),
            in_specs=in_specs,
            out_specs=pl.BlockSpec((1, T, C), lambda b: (b, 0, 0)),
        ),
        compiler_params=pltpu.CompilerParams(
            dimension_semantics=("parallel",),
            vmem_limit_bytes=64 * 1024 * 1024,
        ),
    )(x, *param_list)


# ---------------- pure-JAX reference (for correctness check) ----------------
def reference_block(x, p, n_head, mxu_dtype=jnp.float32):
    def ln(h, g, b, eps=1e-5):
        mu = jnp.mean(h, axis=-1, keepdims=True)
        var = jnp.mean((h - mu) ** 2, axis=-1, keepdims=True)
        return (h - mu) / jnp.sqrt(var + eps) * g + b

    def mm(a, w):
        return jnp.matmul(a.astype(mxu_dtype), w.astype(mxu_dtype),
                          preferred_element_type=jnp.float32)

    B, T, C = x.shape
    hd = C // n_head
    h = ln(x, p["ln1_g"], p["ln1_b"])
    q = mm(h, p["wq"]) + p["bq"]
    k = mm(h, p["wk"]) + p["bk"]
    v = mm(h, p["wv"]) + p["bv"]
    q = q.reshape(B, T, n_head, hd).transpose(0, 2, 1, 3)
    k = k.reshape(B, T, n_head, hd).transpose(0, 2, 1, 3)
    v = v.reshape(B, T, n_head, hd).transpose(0, 2, 1, 3)
    att = jnp.matmul(q.astype(mxu_dtype), k.transpose(0, 1, 3, 2).astype(mxu_dtype),
                     preferred_element_type=jnp.float32) / math.sqrt(hd)
    mask = jnp.tril(jnp.ones((T, T), bool))
    att = jnp.where(mask[None, None], att, -jnp.inf)
    att = jax.nn.softmax(att, axis=-1)
    y = jnp.matmul(att.astype(mxu_dtype), v.astype(mxu_dtype),
                   preferred_element_type=jnp.float32)
    y = y.transpose(0, 2, 1, 3).reshape(B, T, C)
    x1 = x + mm(y, p["wproj"]) + p["bproj"]
    h2 = ln(x1, p["ln2_g"], p["ln2_b"])
    hm = mm(h2, p["w1"]) + p["b1"]
    hm = 0.5 * hm * (1.0 + lax.erf(hm / math.sqrt(2.0)))
    return x1 + mm(hm, p["w2"]) + p["b2"]


def init_params(key, n_embd):
    def linear(k, fan_in, fan_out):
        kw, kb = jax.random.split(k)
        bound = 1.0 / math.sqrt(fan_in)
        w = jax.random.uniform(kw, (fan_in, fan_out), jnp.float32, -bound, bound)
        b = jax.random.uniform(kb, (1, fan_out), jnp.float32, -bound, bound)
        return w, b

    keys = jax.random.split(key, 6)
    wq, bq = linear(keys[0], n_embd, n_embd)
    wk, bk = linear(keys[1], n_embd, n_embd)
    wv, bv = linear(keys[2], n_embd, n_embd)
    wproj, bproj = linear(keys[3], n_embd, n_embd)
    w1, b1 = linear(keys[4], n_embd, 4 * n_embd)
    w2, b2 = linear(keys[5], 4 * n_embd, n_embd)
    return dict(
        ln1_g=jnp.ones((1, n_embd), jnp.float32), ln1_b=jnp.zeros((1, n_embd), jnp.float32),
        ln2_g=jnp.ones((1, n_embd), jnp.float32), ln2_b=jnp.zeros((1, n_embd), jnp.float32),
        wq=wq, bq=bq, wk=wk, bk=bk, wv=wv, bv=bv,
        wproj=wproj, bproj=bproj, w1=w1, b1=b1, w2=w2, b2=b2,
    )


if __name__ == "__main__":
    # C is a lane-width multiple (128) per the layout feedback; block_size = T = 16.
    B, T, C, n_head = 2, 16, 128, 4
    key = jax.random.PRNGKey(0)
    kx, kp = jax.random.split(key)
    x = jax.random.normal(kx, (B, T, C), jnp.float32)
    params = init_params(kp, C)

    out = jax.block_until_ready(transformer_block(x, params, n_head))
    assert out.shape == (B, T, C)
    assert not jnp.any(jnp.isnan(out))

    # Kernel uses bf16 matmul operands + approximate reciprocal, so:
    #  - tight check vs. a reference that also does bf16 matmuls (same precision regime)
    ref_bf16 = reference_block(x, params, n_head, mxu_dtype=jnp.bfloat16)
    assert jnp.allclose(out, ref_bf16, atol=1e-2, rtol=1e-2), "mismatch vs bf16-matmul reference"
    #  - looser sanity check vs. the full-f32 PyTorch-equivalent reference
    ref_f32 = reference_block(x, params, n_head, mxu_dtype=jnp.float32)
    assert jnp.allclose(out, ref_f32, atol=5e-2, rtol=5e-2), "mismatch vs f32 reference"

    print("KERNEL_OK")
</pallas_src>

<mosaic_0001>
module attributes {stable_mosaic.version = 11 : i64} {
  func.func @block_kernel(%arg0: i32, %arg1: memref<1x16x128xf32, #tpu.memory_space<vmem>>, %arg2: memref<1x128xf32, #tpu.memory_space<vmem>>, %arg3: memref<1x128xf32, #tpu.memory_space<vmem>>, %arg4: memref<128x384xbf16, #tpu.memory_space<vmem>>, %arg5: memref<1x384xf32, #tpu.memory_space<vmem>>, %arg6: memref<128x128xbf16, #tpu.memory_space<vmem>>, %arg7: memref<1x128xf32, #tpu.memory_space<vmem>>, %arg8: memref<1x128xf32, #tpu.memory_space<vmem>>, %arg9: memref<1x128xf32, #tpu.memory_space<vmem>>, %arg10: memref<128x512xbf16, #tpu.memory_space<vmem>>, %arg11: memref<1x512xf32, #tpu.memory_space<vmem>>, %arg12: memref<512x128xbf16, #tpu.memory_space<vmem>>, %arg13: memref<1x128xf32, #tpu.memory_space<vmem>>, %arg14: memref<1x16x128xf32, #tpu.memory_space<vmem>>) attributes {dimension_semantics = [#tpu.dimension_semantics<parallel>], iteration_bounds = array<i64: 2>, scalar_prefetch = 0 : i64, scratch_operands = 0 : i64, tpu.core_type = #tpu.core_type<tc>, window_params = [{transform_indices = @transform_0, window_bounds = array<i64: 1, 16, 128>}, {pipeline_mode = #tpu.pipeline_mode<synchronous>, transform_indices = @transform_1, window_bounds = array<i64: 1, 128>}, {pipeline_mode = #tpu.pipeline_mode<synchronous>, transform_indices = @transform_2, window_bounds = array<i64: 1, 128>}, {pipeline_mode = #tpu.pipeline_mode<synchronous>, transform_indices = @transform_3, window_bounds = array<i64: 128, 384>}, {pipeline_mode = #tpu.pipeline_mode<synchronous>, transform_indices = @transform_4, window_bounds = array<i64: 1, 384>}, {pipeline_mode = #tpu.pipeline_mode<synchronous>, transform_indices = @transform_5, window_bounds = array<i64: 128, 128>}, {pipeline_mode = #tpu.pipeline_mode<synchronous>, transform_indices = @transform_6, window_bounds = array<i64: 1, 128>}, {pipeline_mode = #tpu.pipeline_mode<synchronous>, transform_indices = @transform_7, window_bounds = array<i64: 1, 128>}, {pipeline_mode = #tpu.pipeline_mode<synchronous>, transform_indices = @transform_8, window_bounds = array<i64: 1, 128>}, {pipeline_mode = #tpu.pipeline_mode<synchronous>, transform_indices = @transform_9, window_bounds = array<i64: 128, 512>}, {pipeline_mode = #tpu.pipeline_mode<synchronous>, transform_indices = @transform_10, window_bounds = array<i64: 1, 512>}, {pipeline_mode = #tpu.pipeline_mode<synchronous>, transform_indices = @transform_11, window_bounds = array<i64: 512, 128>}, {pipeline_mode = #tpu.pipeline_mode<synchronous>, transform_indices = @transform_12, window_bounds = array<i64: 1, 128>}, {transform_indices = @transform_13, window_bounds = array<i64: 1, 16, 128>}]} {
    %c0 = arith.constant 0 : index
    %c0_0 = arith.constant 0 : index
    %c0_1 = arith.constant 0 : index
    %0 = vector.load %arg1[%c0, %c0_0, %c0_1] : memref<1x16x128xf32, #tpu.memory_space<vmem>>, vector<1x16x128xf32>
    %1 = vector.shape_cast %0 : vector<1x16x128xf32> to vector<16x128xf32>
    %c0_2 = arith.constant 0 : index
    %c0_3 = arith.constant 0 : index
    %2 = vector.load %arg2[%c0_2, %c0_3] : memref<1x128xf32, #tpu.memory_space<vmem>>, vector<1x128xf32>
    %c0_4 = arith.constant 0 : index
    %c0_5 = arith.constant 0 : index
    %3 = vector.load %arg3[%c0_4, %c0_5] : memref<1x128xf32, #tpu.memory_space<vmem>>, vector<1x128xf32>
    %cst = arith.constant dense<0.000000e+00> : vector<16xf32>
    %4 = vector.multi_reduction <add>, %1, %cst [1] : vector<16x128xf32> to vector<16xf32>
    %5 = vector.shape_cast %4 : vector<16xf32> to vector<16x1xf32>
    %cst_6 = arith.constant 1.280000e+02 : f32
    %6 = vector.broadcast %cst_6 : f32 to vector<16x1xf32>
    %7 = arith.divf %5, %6 : vector<16x1xf32>
    %8 = vector.broadcast %7 : vector<16x1xf32> to vector<16x128xf32>
    %9 = arith.subf %1, %8 : vector<16x128xf32>
    %10 = arith.mulf %9, %9 : vector<16x128xf32>
    %cst_7 = arith.constant dense<0.000000e+00> : vector<16xf32>
    %11 = vector.multi_reduction <add>, %10, %cst_7 [1] : vector<16x128xf32> to vector<16xf32>
    %12 = vector.shape_cast %11 : vector<16xf32> to vector<16x1xf32>
    %cst_8 = arith.constant 1.280000e+02 : f32
    %13 = vector.broadcast %cst_8 : f32 to vector<16x1xf32>
    %14 = arith.divf %12, %13 : vector<16x1xf32>
    %15 = vector.broadcast %7 : vector<16x1xf32> to vector<16x128xf32>
    %16 = arith.subf %1, %15 : vector<16x128xf32>
    %cst_9 = arith.constant 9.99999974E-6 : f32
    %17 = vector.broadcast %cst_9 : f32 to vector<16x1xf32>
    %18 = arith.addf %14, %17 : vector<16x1xf32>
    %19 = math.rsqrt %18 : vector<16x1xf32>
    %20 = vector.broadcast %19 : vector<16x1xf32> to vector<16x128xf32>
    %21 = arith.mulf %16, %20 : vector<16x128xf32>
    %22 = vector.broadcast %2 : vector<1x128xf32> to vector<16x128xf32>
    %23 = arith.mulf %21, %22 : vector<16x128xf32>
    %24 = vector.broadcast %3 : vector<1x128xf32> to vector<16x128xf32>
    %25 = arith.addf %23, %24 : vector<16x128xf32>
    %26 = arith.truncf %25 : vector<16x128xf32> to vector<16x128xbf16>
    %c0_10 = arith.constant 0 : index
    %c0_11 = arith.constant 0 : index
    %27 = vector.load %arg4[%c0_10, %c0_11] : memref<128x384xbf16, #tpu.memory_space<vmem>>, vector<128x384xbf16>
    %cst_12 = arith.constant dense<0.000000e+00> : vector<16x384xf32>
    %28 = tpu.matmul %26, %27, %cst_12 {dimension_numbers = #tpu.dot_dimension_numbers<[1], [0], [0], [1], [0, 0, 1, 1], [], []>} : vector<16x128xbf16>, vector<128x384xbf16>, vector<16x384xf32> -> vector<16x384xf32>
    %c0_13 = arith.constant 0 : index
    %c0_14 = arith.constant 0 : index
    %29 = vector.load %arg5[%c0_13, %c0_14] : memref<1x384xf32, #tpu.memory_space<vmem>>, vector<1x384xf32>
    %30 = vector.broadcast %29 : vector<1x384xf32> to vector<16x384xf32>
    %31 = arith.addf %28, %30 : vector<16x384xf32>
    %32 = vector.extract_strided_slice %31 {offsets = [0, 0], sizes = [16, 128], strides = [1, 1]} : vector<16x384xf32> to vector<16x128xf32>
    %33 = vector.extract_strided_slice %32 {offsets = [0, 0], sizes = [16, 32], strides = [1, 1]} : vector<16x128xf32> to vector<16x32xf32>
    %34 = vector.extract_strided_slice %32 {offsets = [0, 32], sizes = [16, 32], strides = [1, 1]} : vector<16x128xf32> to vector<16x32xf32>
    %35 = vector.extract_strided_slice %32 {offsets = [0, 64], sizes = [16, 32], strides = [1, 1]} : vector<16x128xf32> to vector<16x32xf32>
    %36 = vector.extract_strided_slice %32 {offsets = [0, 96], sizes = [16, 32], strides = [1, 1]} : vector<16x128xf32> to vector<16x32xf32>
    %37 = vector.shape_cast %33 : vector<16x32xf32> to vector<1x16x32xf32>
    %38 = vector.shape_cast %34 : vector<16x32xf32> to vector<1x16x32xf32>
    %39 = vector.shape_cast %35 : vector<16x32xf32> to vector<1x16x32xf32>
    %40 = vector.shape_cast %36 : vector<16x32xf32> to vector<1x16x32xf32>
    %41 = tpu.concatenate %37, %38, %39, %40 in 0 : vector<1x16x32xf32>, vector<1x16x32xf32>, vector<1x16x32xf32>, vector<1x16x32xf32> -> vector<4x16x32xf32>
    %cst_15 = arith.constant 0.176776692 : f32
    %42 = vector.broadcast %cst_15 : f32 to vector<4x16x32xf32>
    %43 = arith.mulf %41, %42 : vector<4x16x32xf32>
    %44 = vector.extract_strided_slice %31 {offsets = [0, 128], sizes = [16, 128], strides = [1, 1]} : vector<16x384xf32> to vector<16x128xf32>
    %45 = vector.extract_strided_slice %44 {offsets = [0, 0], sizes = [16, 32], strides = [1, 1]} : vector<16x128xf32> to vector<16x32xf32>
    %46 = vector.extract_strided_slice %44 {offsets = [0, 32], sizes = [16, 32], strides = [1, 1]} : vector<16x128xf32> to vector<16x32xf32>
    %47 = vector.extract_strided_slice %44 {offsets = [0, 64], sizes = [16, 32], strides = [1, 1]} : vector<16x128xf32> to vector<16x32xf32>
    %48 = vector.extract_strided_slice %44 {offsets = [0, 96], sizes = [16, 32], strides = [1, 1]} : vector<16x128xf32> to vector<16x32xf32>
    %49 = vector.shape_cast %45 : vector<16x32xf32> to vector<1x16x32xf32>
    %50 = vector.shape_cast %46 : vector<16x32xf32> to vector<1x16x32xf32>
    %51 = vector.shape_cast %47 : vector<16x32xf32> to vector<1x16x32xf32>
    %52 = vector.shape_cast %48 : vector<16x32xf32> to vector<1x16x32xf32>
    %53 = tpu.concatenate %49, %50, %51, %52 in 0 : vector<1x16x32xf32>, vector<1x16x32xf32>, vector<1x16x32xf32>, vector<1x16x32xf32> -> vector<4x16x32xf32>
    %54 = vector.extract_strided_slice %31 {offsets = [0, 256], sizes = [16, 128], strides = [1, 1]} : vector<16x384xf32> to vector<16x128xf32>
    %55 = vector.extract_strided_slice %54 {offsets = [0, 0], sizes = [16, 32], strides = [1, 1]} : vector<16x128xf32> to vector<16x32xf32>
    %56 = vector.extract_strided_slice %54 {offsets = [0, 32], sizes = [16, 32], strides = [1, 1]} : vector<16x128xf32> to vector<16x32xf32>
    %57 = vector.extract_strided_slice %54 {offsets = [0, 64], sizes = [16, 32], strides = [1, 1]} : vector<16x128xf32> to vector<16x32xf32>
    %58 = vector.extract_strided_slice %54 {offsets = [0, 96], sizes = [16, 32], strides = [1, 1]} : vector<16x128xf32> to vector<16x32xf32>
    %59 = vector.shape_cast %55 : vector<16x32xf32> to vector<1x16x32xf32>
    %60 = vector.shape_cast %56 : vector<16x32xf32> to vector<1x16x32xf32>
    %61 = vector.shape_cast %57 : vector<16x32xf32> to vector<1x16x32xf32>
    %62 = vector.shape_cast %58 : vector<16x32xf32> to vector<1x16x32xf32>
    %63 = tpu.concatenate %59, %60, %61, %62 in 0 : vector<1x16x32xf32>, vector<1x16x32xf32>, vector<1x16x32xf32>, vector<1x16x32xf32> -> vector<4x16x32xf32>
    %64 = arith.truncf %43 : vector<4x16x32xf32> to vector<4x16x32xbf16>
    %65 = arith.truncf %53 : vector<4x16x32xf32> to vector<4x16x32xbf16>
    "tpu.trace_start"() <{level = 10 : i32, message = "hqd,hkd->hqk"}> : () -> ()
    %cst_16 = arith.constant dense<0.000000e+00> : vector<4x16x16xf32>
    %66 = tpu.matmul %64, %65, %cst_16 {dimension_numbers = #tpu.dot_dimension_numbers<[2], [2], [1], [1], [0, 0, 0, 1, 1, 1], [0], [0]>} : vector<4x16x32xbf16>, vector<4x16x32xbf16>, vector<4x16x16xf32> -> vector<4x16x16xf32>
    "tpu.trace_stop"() : () -> ()
    %67 = tpu.iota {dimensions = array<i32: 0>} : vector<16x16xi32>
    %68 = tpu.iota {dimensions = array<i32: 1>} : vector<16x16xi32>
    %69 = arith.cmpi sge, %67, %68 : vector<16x16xi32>
    %70 = vector.shape_cast %69 : vector<16x16xi1> to vector<1x16x16xi1>
    %cst_17 = arith.constant -1.000000e+30 : f32
    %71 = vector.shape_cast %70 : vector<1x16x16xi1> to vector<1x16x16xi1>
    %72 = vector.broadcast %71 : vector<1x16x16xi1> to vector<4x16x16xi1>
    %73 = vector.broadcast %cst_17 : f32 to vector<4x16x16xf32>
    %74 = arith.select %72, %66, %73 : vector<4x16x16xi1>, vector<4x16x16xf32>
    %cst_18 = arith.constant dense<0xFF800000> : vector<4x16xf32>
    %75 = vector.multi_reduction <maximumf>, %74, %cst_18 [2] : vector<4x16x16xf32> to vector<4x16xf32>
    %76 = vector.shape_cast %75 : vector<4x16xf32> to vector<4x16x1xf32>
    %77 = vector.broadcast %76 : vector<4x16x1xf32> to vector<4x16x16xf32>
    %78 = arith.subf %74, %77 : vector<4x16x16xf32>
    %79 = math.exp %78 : vector<4x16x16xf32>
    %cst_19 = arith.constant dense<0.000000e+00> : vector<4x16xf32>
    %80 = vector.multi_reduction <add>, %79, %cst_19 [2] : vector<4x16x16xf32> to vector<4x16xf32>
    %81 = vector.shape_cast %80 : vector<4x16xf32> to vector<4x16x1xf32>
    %82 = tpu.reciprocal %81 {approx = true} : vector<4x16x1xf32> -> vector<4x16x1xf32>
    %83 = vector.broadcast %82 : vector<4x16x1xf32> to vector<4x16x16xf32>
    %84 = arith.mulf %79, %83 : vector<4x16x16xf32>
    %85 = arith.truncf %84 : vector<4x16x16xf32> to vector<4x16x16xbf16>
    %86 = arith.truncf %63 : vector<4x16x32xf32> to vector<4x16x32xbf16>
    "tpu.trace_start"() <{level = 10 : i32, message = "hqk,hkd->hqd"}> : () -> ()
    %cst_20 = arith.constant dense<0.000000e+00> : vector<4x16x32xf32>
    %87 = tpu.matmul %85, %86, %cst_20 {dimension_numbers = #tpu.dot_dimension_numbers<[2], [1], [1], [2], [0, 0, 0, 1, 1, 2], [0], [0]>} : vector<4x16x16xbf16>, vector<4x16x32xbf16>, vector<4x16x32xf32> -> vector<4x16x32xf32>
    "tpu.trace_stop"() : () -> ()
    %88 = vector.extract_strided_slice %87 {offsets = [0, 0, 0], sizes = [1, 16, 32], strides = [1, 1, 1]} : vector<4x16x32xf32> to vector<1x16x32xf32>
    %89 = vector.shape_cast %88 : vector<1x16x32xf32> to vector<16x32xf32>
    %90 = vector.extract_strided_slice %87 {offsets = [1, 0, 0], sizes = [1, 16, 32], strides = [1, 1, 1]} : vector<4x16x32xf32> to vector<1x16x32xf32>
    %91 = vector.shape_cast %90 : vector<1x16x32xf32> to vector<16x32xf32>
    %92 = vector.extract_strided_slice %87 {offsets = [2, 0, 0], sizes = [1, 16, 32], strides = [1, 1, 1]} : vector<4x16x32xf32> to vector<1x16x32xf32>
    %93 = vector.shape_cast %92 : vector<1x16x32xf32> to vector<16x32xf32>
    %94 = vector.extract_strided_slice %87 {offsets = [3, 0, 0], sizes = [1, 16, 32], strides = [1, 1, 1]} : vector<4x16x32xf32> to vector<1x16x32xf32>
    %95 = vector.shape_cast %94 : vector<1x16x32xf32> to vector<16x32xf32>
    %96 = tpu.concatenate %89, %91, %93, %95 in 1 : vector<16x32xf32>, vector<16x32xf32>, vector<16x32xf32>, vector<16x32xf32> -> vector<16x128xf32>
    %97 = arith.truncf %96 : vector<16x128xf32> to vector<16x128xbf16>
    %c0_21 = arith.constant 0 : index
    %c0_22 = arith.constant 0 : index
    %98 = vector.load %arg6[%c0_21, %c0_22] : memref<128x128xbf16, #tpu.memory_space<vmem>>, vector<128x128xbf16>
    %cst_23 = arith.constant dense<0.000000e+00> : vector<16x128xf32>
    %99 = tpu.matmul %97, %98, %cst_23 {dimension_numbers = #tpu.dot_dimension_numbers<[1], [0], [0], [1], [0, 0, 1, 1], [], []>} : vector<16x128xbf16>, vector<128x128xbf16>, vector<16x128xf32> -> vector<16x128xf32>
    %c0_24 = arith.constant 0 : index
    %c0_25 = arith.constant 0 : index
    %100 = vector.load %arg7[%c0_24, %c0_25] : memref<1x128xf32, #tpu.memory_space<vmem>>, vector<1x128xf32>
    %101 = vector.broadcast %100 : vector<1x128xf32> to vector<16x128xf32>
    %102 = arith.addf %99, %101 : vector<16x128xf32>
    %103 = arith.addf %1, %102 : vector<16x128xf32>
    %c0_26 = arith.constant 0 : index
    %c0_27 = arith.constant 0 : index
    %104 = vector.load %arg8[%c0_26, %c0_27] : memref<1x128xf32, #tpu.memory_space<vmem>>, vector<1x128xf32>
    %c0_28 = arith.constant 0 : index
    %c0_29 = arith.constant 0 : index
    %105 = vector.load %arg9[%c0_28, %c0_29] : memref<1x128xf32, #tpu.memory_space<vmem>>, vector<1x128xf32>
    %cst_30 = arith.constant dense<0.000000e+00> : vector<16xf32>
    %106 = vector.multi_reduction <add>, %103, %cst_30 [1] : vector<16x128xf32> to vector<16xf32>
    %107 = vector.shape_cast %106 : vector<16xf32> to vector<16x1xf32>
    %cst_31 = arith.constant 1.280000e+02 : f32
    %108 = vector.broadcast %cst_31 : f32 to vector<16x1xf32>
    %109 = arith.divf %107, %108 : vector<16x1xf32>
    %110 = vector.broadcast %109 : vector<16x1xf32> to vector<16x128xf32>
    %111 = arith.subf %103, %110 : vector<16x128xf32>
    %112 = arith.mulf %111, %111 : vector<16x128xf32>
    %cst_32 = arith.constant dense<0.000000e+00> : vector<16xf32>
    %113 = vector.multi_reduction <add>, %112, %cst_32 [1] : vector<16x128xf32> to vector<16xf32>
    %114 = vector.shape_cast %113 : vector<16xf32> to vector<16x1xf32>
    %cst_33 = arith.constant 1.280000e+02 : f32
    %115 = vector.broadcast %cst_33 : f32 to vector<16x1xf32>
    %116 = arith.divf %114, %115 : vector<16x1xf32>
    %117 = vector.broadcast %109 : vector<16x1xf32> to vector<16x128xf32>
    %118 = arith.subf %103, %117 : vector<16x128xf32>
    %cst_34 = arith.constant 9.99999974E-6 : f32
    %119 = vector.broadcast %cst_34 : f32 to vector<16x1xf32>
    %120 = arith.addf %116, %119 : vector<16x1xf32>
    %121 = math.rsqrt %120 : vector<16x1xf32>
    %122 = vector.broadcast %121 : vector<16x1xf32> to vector<16x128xf32>
    %123 = arith.mulf %118, %122 : vector<16x128xf32>
    %124 = vector.broadcast %104 : vector<1x128xf32> to vector<16x128xf32>
    %125 = arith.mulf %123, %124 : vector<16x128xf32>
    %126 = vector.broadcast %105 : vector<1x128xf32> to vector<16x128xf32>
    %127 = arith.addf %125, %126 : vector<16x128xf32>
    %128 = arith.truncf %127 : vector<16x128xf32> to vector<16x128xbf16>
    %c0_35 = arith.constant 0 : index
    %c0_36 = arith.constant 0 : index
    %129 = vector.load %arg10[%c0_35, %c0_36] : memref<128x512xbf16, #tpu.memory_space<vmem>>, vector<128x512xbf16>
    %cst_37 = arith.constant dense<0.000000e+00> : vector<16x512xf32>
    %130 = tpu.matmul %128, %129, %cst_37 {dimension_numbers = #tpu.dot_dimension_numbers<[1], [0], [0], [1], [0, 0, 1, 1], [], []>} : vector<16x128xbf16>, vector<128x512xbf16>, vector<16x512xf32> -> vector<16x512xf32>
    %c0_38 = arith.constant 0 : index
    %c0_39 = arith.constant 0 : index
    %131 = vector.load %arg11[%c0_38, %c0_39] : memref<1x512xf32, #tpu.memory_space<vmem>>, vector<1x512xf32>
    %132 = vector.broadcast %131 : vector<1x512xf32> to vector<16x512xf32>
    %133 = arith.addf %130, %132 : vector<16x512xf32>
    %cst_40 = arith.constant 5.000000e-01 : f32
    %134 = vector.broadcast %cst_40 : f32 to vector<16x512xf32>
    %135 = arith.mulf %134, %133 : vector<16x512xf32>
    %cst_41 = arith.constant 0.707106769 : f32
    %136 = vector.broadcast %cst_41 : f32 to vector<16x512xf32>
    %137 = arith.mulf %133, %136 : vector<16x512xf32>
    %138 = math.erf %137 : vector<16x512xf32>
    %cst_42 = arith.constant 1.000000e+00 : f32
    %139 = vector.broadcast %cst_42 : f32 to vector<16x512xf32>
    %140 = arith.addf %139, %138 : vector<16x512xf32>
    %141 = arith.mulf %135, %140 : vector<16x512xf32>
    %142 = arith.truncf %141 : vector<16x512xf32> to vector<16x512xbf16>
    %c0_43 = arith.constant 0 : index
    %c0_44 = arith.constant 0 : index
    %143 = vector.load %arg12[%c0_43, %c0_44] : memref<512x128xbf16, #tpu.memory_space<vmem>>, vector<512x128xbf16>
    %cst_45 = arith.constant dense<0.000000e+00> : vector<16x128xf32>
    %144 = tpu.matmul %142, %143, %cst_45 {dimension_numbers = #tpu.dot_dimension_numbers<[1], [0], [0], [1], [0, 0, 1, 1], [], []>} : vector<16x512xbf16>, vector<512x128xbf16>, vector<16x128xf32> -> vector<16x128xf32>
    %c0_46 = arith.constant 0 : index
    %c0_47 = arith.constant 0 : index
    %145 = vector.load %arg13[%c0_46, %c0_47] : memref<1x128xf32, #tpu.memory_space<vmem>>, vector<1x128xf32>
    %146 = vector.broadcast %145 : vector<1x128xf32> to vector<16x128xf32>
    %147 = arith.addf %144, %146 : vector<16x128xf32>
    %148 = arith.addf %103, %147 : vector<16x128xf32>
    %c0_48 = arith.constant 0 : index
    %c0_49 = arith.constant 0 : index
    %c0_50 = arith.constant 0 : index
    %149 = vector.load %arg14[%c0_48, %c0_49, %c0_50] : memref<1x16x128xf32, #tpu.memory_space<vmem>>, vector<1x16x128xf32>
    %150 = vector.shape_cast %149 : vector<1x16x128xf32> to vector<16x128xf32>
    %151 = vector.shape_cast %148 : vector<16x128xf32> to vector<1x16x128xf32>
    tpu.vector_store %arg14[%c0_48, %c0_49, %c0_50], %151 {strides = array<i32>} : memref<1x16x128xf32, #tpu.memory_space<vmem>>, vector<1x16x128xf32>,
    return
  }
  func.func @transform_0(%arg0: i32) -> (i32, i32, i32) {
    %c0_i32 = arith.constant 0 : i32
    %c0_i32_0 = arith.constant 0 : i32
    %c0_i32_1 = arith.constant 0 : i32
    return %arg0, %c0_i32, %c0_i32_0 : i32, i32, i32
  }
  func.func @transform_1(%arg0: i32) -> (i32, i32) {
    %c0_i32 = arith.constant 0 : i32
    %c0_i32_0 = arith.constant 0 : i32
    %c0_i32_1 = arith.constant 0 : i32
    return %c0_i32, %c0_i32_0 : i32, i32
  }
  func.func @transform_2(%arg0: i32) -> (i32, i32) {
    %c0_i32 = arith.constant 0 : i32
    %c0_i32_0 = arith.constant 0 : i32
    %c0_i32_1 = arith.constant 0 : i32
    return %c0_i32, %c0_i32_0 : i32, i32
  }
  func.func @transform_3(%arg0: i32) -> (i32, i32) {
    %c0_i32 = arith.constant 0 : i32
    %c0_i32_0 = arith.constant 0 : i32
    %c0_i32_1 = arith.constant 0 : i32
    return %c0_i32, %c0_i32_0 : i32, i32
  }
  func.func @transform_4(%arg0: i32) -> (i32, i32) {
    %c0_i32 = arith.constant 0 : i32
    %c0_i32_0 = arith.constant 0 : i32
    %c0_i32_1 = arith.constant 0 : i32
    return %c0_i32, %c0_i32_0 : i32, i32
  }
  func.func @transform_5(%arg0: i32) -> (i32, i32) {
    %c0_i32 = arith.constant 0 : i32
    %c0_i32_0 = arith.constant 0 : i32
    %c0_i32_1 = arith.constant 0 : i32
    return %c0_i32, %c0_i32_0 : i32, i32
  }
  func.func @transform_6(%arg0: i32) -> (i32, i32) {
    %c0_i32 = arith.constant 0 : i32
    %c0_i32_0 = arith.constant 0 : i32
    %c0_i32_1 = arith.constant 0 : i32
    return %c0_i32, %c0_i32_0 : i32, i32
  }
  func.func @transform_7(%arg0: i32) -> (i32, i32) {
    %c0_i32 = arith.constant 0 : i32
    %c0_i32_0 = arith.constant 0 : i32
    %c0_i32_1 = arith.constant 0 : i32
    return %c0_i32, %c0_i32_0 : i32, i32
  }
  func.func @transform_8(%arg0: i32) -> (i32, i32) {
    %c0_i32 = arith.constant 0 : i32
    %c0_i32_0 = arith.constant 0 : i32
    %c0_i32_1 = arith.constant 0 : i32
    return %c0_i32, %c0_i32_0 : i32, i32
  }
  func.func @transform_9(%arg0: i32) -> (i32, i32) {
    %c0_i32 = arith.constant 0 : i32
    %c0_i32_0 = arith.constant 0 : i32
    %c0_i32_1 = arith.constant 0 : i32
    return %c0_i32, %c0_i32_0 : i32, i32
  }
  func.func @transform_10(%arg0: i32) -> (i32, i32) {
    %c0_i32 = arith.constant 0 : i32
    %c0_i32_0 = arith.constant 0 : i32
    %c0_i32_1 = arith.constant 0 : i32
    return %c0_i32, %c0_i32_0 : i32, i32
  }
  func.func @transform_11(%arg0: i32) -> (i32, i32) {
    %c0_i32 = arith.constant 0 : i32
    %c0_i32_0 = arith.constant 0 : i32
    %c0_i32_1 = arith.constant 0 : i32
    return %c0_i32, %c0_i32_0 : i32, i32
  }
  func.func @transform_12(%arg0: i32) -> (i32, i32) {
    %c0_i32 = arith.constant 0 : i32
    %c0_i32_0 = arith.constant 0 : i32
    %c0_i32_1 = arith.constant 0 : i32
    return %c0_i32, %c0_i32_0 : i32, i32
  }
  func.func @transform_13(%arg0: i32) -> (i32, i32, i32) {
    %c0_i32 = arith.constant 0 : i32
    %c0_i32_0 = arith.constant 0 : i32
    %c0_i32_1 = arith.constant 0 : i32
    return %arg0, %c0_i32, %c0_i32_0 : i32, i32, i32
  }
}

</mosaic_0001>

<bundles_post_ra>
// kernel: tpu_custom_call.1
= control target key start
LH: loop header
LB: loop body
LE: loop exit
PB: predicated region body
PF: predicated region fallthrough
CT: control target
= control target key end

     0   :  { %s4469_s0 = inlined_call_operand.hbm [shape: f32[2,16,128], index: 0, kind: input, shape index: {}]   ;;  %s4470_s1 = inlined_call_operand.hbm [shape: f32[1,128], index: 1, kind: input, shape index: {}]   ;;  %s4471_s2 = inlined_call_operand.hbm [shape: f32[1,128], index: 2, kind: input, shape index: {}]   ;;  %s4472_s3 = inlined_call_operand.hbm [shape: bf16[128,384], index: 3, kind: input, shape index: {}]   ;;  %s4473_s4 = inlined_call_operand.hbm [shape: f32[1,384], index: 4, kind: input, shape index: {}]   ;;  %s4474_s5 = inlined_call_operand.hbm [shape: bf16[128,128], index: 5, kind: input, shape index: {}]   ;;  %s4475_s6 = inlined_call_operand.hbm [shape: f32[1,128], index: 6, kind: input, shape index: {}]   ;;  %s4476_s7 = inlined_call_operand.hbm [shape: f32[1,128], index: 7, kind: input, shape index: {}]   ;;  %s4477_s8 = inlined_call_operand.hbm [shape: f32[1,128], index: 8, kind: input, shape index: {}]   ;;  %s4478_s9 = inlined_call_operand.hbm [shape: bf16[128,512], index: 9, kind: input, shape index: {}]   ;;  %s4479_s10 = inlined_call_operand.hbm [shape: f32[1,512], index: 10, kind: input, shape index: {}]   ;;  %s4480_s11 = inlined_call_operand.hbm [shape: bf16[512,128], index: 11, kind: input, shape index: {}]   ;;  %s4481_s12 = inlined_call_operand.hbm [shape: f32[1,128], index: 12, kind: input, shape index: {}]   ;;  %s4482_s13 = inlined_call_operand.hbm [shape: f32[2,16,128], index: 13, kind: output, shape index: {}]  }
   0x1   :  { %4494 = sst [smem:[#allocation35_spill]] %s4469_s0 }
   0x2   :  { %4495 = sst [smem:[#allocation36_spill]] %s4470_s1 }
   0x3   :  { %4496 = sst [smem:[#allocation37_spill]] %s4472_s3 }
   0x4   :  { %4497 = sst [smem:[#allocation38_spill]] %s4482_s13 }
   0x5   :  { %18 = vsyncpa [#allocation3], 0 }
   0x6   :  { %20 = vsyncpa [#allocation3 + $0x1], 0 }
   0x7   :  { %21 = vsyncpa [#allocation6], 0 }
   0x8   :  { %22 = vsyncpa [#allocation9], 0 }
   0x9   :  { %23 = vsyncpa [#allocation12], 0 }
   0xa   :  { %24 = vsyncpa [#allocation15], 0 }
   0xb   :  { %25 = vsyncpa [#allocation18], 0 }
   0xc   :  { %26 = vsyncpa [#allocation21], 0 }
   0xd   :  { %27 = vsyncpa [#allocation4], 0 }
   0xe   :  { %29 = vsyncpa [#allocation4 + $0x1], 0  ;;  %s3842_s25 = smov 0   ;;  %s3844_s26 = smov 0  }
   0xf   :  { %s3846_s27 = smov 0   ;;  %s3848_s28 = smov 0  }
  0x10 LB: > { %4498 = sst [smem:[#allocation32_spill]] %s3728_s25  ;;  %s3742_s29 = smov [#allocation5]   ;;  %s3740_s28 = sphi %s3848_s28, %s4540_s28   ;;  %s3736_s27 = sphi %s3846_s27, %s4539_s27   ;;  %s3732_s26 = sphi %s3844_s26, %s4538_s26   ;;  %s3728_s25 = sphi %s3842_s25, %s4537_s25  }
  0x11   : > { %s357_s30 = sshll.u32 %s3742_s29, 4  ;;  %s3863_s14 = sadd.s32 4294967295, %s3740_s28   ;;  %s3868_s30 = int_to_ptr.vmem [resolvable:$true] %s357_s30 }
  0x12   : > { %4499 = sst [smem:[#allocation33_spill]] %s3863_s14  ;;  %p2563_p0 = scmp.ge.s32.totalorder %s3740_s28, 1 }
  0x13   : > { %p4489_p1 = scmp.eq.s32.totalorder %s3863_s14, 0  ;;  %p344_p2 = scmp.lt.s32.totalorder %s3740_s28, 3 }
  0x14   : > { %s3743_s16 = smov [#allocation8]   ;;  %s3744_s19 = smov [#allocation11]  }
  0x15   : > { %p3870_p3 = pnand %p2563_p0, %p344_p2  ;;  %s378_s17 = sshll.u32 %s3743_s16, 4  ;;  %s3877_s17 = int_to_ptr.vmem [resolvable:$true] %s378_s17 }
  0x16   : > { %s402_s20 = sshll.u32 %s3744_s19, 4  ;;  %s4503_s1 = sld [smem:[#allocation36_spill]]  ;;  %s3885_s20 = int_to_ptr.vmem [resolvable:$true] %s402_s20 }
  0x17   : > { %s4500_s15 = scalar_select %p3870_p3, 1, 0 }
  0x18   : > { %p2930_p5 = pneg %p3870_p3 }
  0x19   : > { %4501 = sst [smem:[#allocation34_spill]] %s4500_s15 }
  0x1a   : > { %p3881_p6 = pnand %p2930_p5, %p4489_p1 }
  0x1c   : > { %s3284_s23 = scalar_lea.hbm %s4503_s1, 16  ;;  %p3895_p8 = pneg %p3881_p6 }
  0x1d   : > { %p3285_p7 = scmp.ne.s32.totalorder %s4503_s1, %s3284_s23  ;;  %p3291_p11 = scmp.lt.u32.totalorder %s3284_s23, %s4503_s1 }
  0x1f   : > { %p3287_p9 = pnand %p3895_p8, %p3285_p7 }
  0x21   : > { %p3288_p10 = pneg %p3287_p9 }
  0x23   : > { %p3293_p12 = pnand %p3291_p11, %p3288_p10 }
  0x25   : > { %3296 = shalt.err (!%p3293_p12)
}
  0x26   : > { %s3297_s21 = scalar_lea.vmem %s3868_s30, 16  ;;  %s3304_s22 = scalar_lea.vmem %s3868_s30, 32 }
  0x27   : > { %p3298_p13 = scmp.ne.s32.totalorder %s3868_s30, %s3297_s21  ;;  %p3305_p5 = scmp.lt.s32.totalorder %s3868_s30, %s3868_s30 }
  0x28   : > { %p3306_p7 = scmp.lt.s32.totalorder %s3304_s22, %s3297_s21 }
  0x29   : > { %p3300_p0 = pnand %p3298_p13, %p3895_p8 }
  0x2a   : > { %p3307_p9 = por %p3306_p7, %p3305_p5 }
  0x2b   : > { %p3301_p2 = pneg %p3300_p0 }
  0x2d   : > { %p3308_p4 = pnand %p3307_p9, %p3301_p2 }
  0x2f   : > { %3311 = shalt.err (!%p3308_p4)
}
  0x30   : > { %2933 = dma.hbm_to_vmem [thread:$0]  (!%p3881_p6), %s4503_s1, 16, %s3868_s30, [#allocation6]  }
  0x31   : > { %s4505_s3 = sld [smem:[#allocation37_spill]] }
  0x37   : > { %s3312_s19 = scalar_lea.hbm %s4505_s3, 3072 }
  0x38   : > { %p3313_p10 = scmp.ne.s32.totalorder %s4505_s3, %s3312_s19  ;;  %p3319_p4 = scmp.lt.u32.totalorder %s3312_s19, %s4505_s3 }
  0x3a   : > { %p3315_p11 = pnand %p3313_p10, %p3895_p8 }
  0x3c   : > { %p3316_p12 = pneg %p3315_p11 }
  0x3e   : > { %p3321_p13 = pnand %p3319_p4, %p3316_p12 }
  0x40   : > { %3324 = shalt.err (!%p3321_p13)
}
  0x41   : > { %s3325_s30 = scalar_lea.vmem %s3877_s17, 3072  ;;  %p3333_p7 = scmp.lt.s32.totalorder %s3877_s17, %s3877_s17 }
  0x42   : > { %p3326_p0 = scmp.ne.s32.totalorder %s3877_s17, %s3325_s30  ;;  %p3334_p9 = scmp.lt.s32.totalorder %s3325_s30, %s3325_s30 }
  0x44   : > { %p3328_p2 = pnand %p3326_p0, %p3895_p8  ;;  %p3335_p10 = por %p3334_p9, %p3333_p7 }
  0x46   : > { %p3329_p5 = pneg %p3328_p2 }
  0x48   : > { %p3336_p11 = pnand %p3335_p10, %p3329_p5 }
  0x4a   : > { %3339 = shalt.err (!%p3336_p11)
}
  0x4b   : > { %s3745_s0 = smov 192   ;;  %s3746_s15 = smov 12  }
  0x4c   : > { %2939 = dma.hbm_to_vmem [thread:$0]  (!%p3881_p6), %s4505_s3, 3072, %s3877_s17, [#allocation9], %s3745_s0, %s3745_s0, %s3746_s15  }
  0x4d   : > { %s3340_s19 = scalar_lea.hbm %s4474_s5, 1024 }
  0x4e   : > { %p3341_p12 = scmp.ne.s32.totalorder %s4474_s5, %s3340_s19  ;;  %p3347_p0 = scmp.lt.u32.totalorder %s3340_s19, %s4474_s5 }
  0x50   : > { %p3343_p4 = pnand %p3341_p12, %p3895_p8 }
  0x52   : > { %p3344_p13 = pneg %p3343_p4 }
  0x54   : > { %p3349_p2 = pnand %p3347_p0, %p3344_p13 }
  0x56   : > { %3352 = shalt.err (!%p3349_p2)
}
  0x57   : > { %s3353_s17 = scalar_lea.vmem %s3885_s20, 1024  ;;  %p3361_p10 = scmp.lt.s32.totalorder %s3885_s20, %s3885_s20 }
  0x58   : > { %p3354_p5 = scmp.ne.s32.totalorder %s3885_s20, %s3353_s17  ;;  %p3362_p11 = scmp.lt.s32.totalorder %s3353_s17, %s3353_s17 }
  0x5a   : > { %p3356_p7 = pnand %p3354_p5, %p3895_p8  ;;  %p3363_p12 = por %p3362_p11, %p3361_p10 }
  0x5c   : > { %p3357_p9 = pneg %p3356_p7 }
  0x5e   : > { %p3364_p4 = pnand %p3363_p12, %p3357_p9 }
  0x60   : > { %3367 = shalt.err (!%p3364_p4)
}
  0x61   : > { %s4491_s0 = smov 64   ;;  %s4492_s1 = smov 4  }
  0x62   : > { %2945 = dma.hbm_to_vmem [thread:$0]  (!%p3881_p6), %s4474_s5, 1024, %s3885_s20, [#allocation12], %s4491_s0, %s4491_s0, %s4492_s1  }
  0x63   : > { %s3749_s23 = smov [#allocation14]   ;;  %s3750_s29 = smov [#allocation17]  }
  0x64   : > { %s427_s24 = sshll.u32 %s3749_s23, 4  ;;  %s448_s19 = sshll.u32 %s3750_s29, 4  ;;  %s428_s24 = int_to_ptr.vmem [resolvable:$true] %s427_s24  ;;  %s449_s19 = int_to_ptr.vmem [resolvable:$true] %s448_s19 }
  0x65   : > { %s3368_s30 = scalar_lea.hbm %s4476_s7, 16 }
  0x66   : > { %p3369_p13 = scmp.ne.s32.totalorder %s4476_s7, %s3368_s30  ;;  %p3375_p5 = scmp.lt.u32.totalorder %s3368_s30, %s4476_s7 }
  0x68   : > { %p3371_p0 = pnand %p3369_p13, %p3895_p8 }
  0x6a   : > { %p3372_p2 = pneg %p3371_p0 }
  0x6c   : > { %p3377_p7 = pnand %p3375_p5, %p3372_p2 }
  0x6e   : > { %3380 = shalt.err (!%p3377_p7)
}
  0x6f   : > { %s3381_s20 = scalar_lea.vmem %s428_s24, 16  ;;  %s3388_s15 = scalar_lea.vmem %s428_s24, 32 }
  0x70   : > { %p3382_p9 = scmp.ne.s32.totalorder %s428_s24, %s3381_s20  ;;  %p3389_p12 = scmp.lt.s32.totalorder %s428_s24, %s428_s24 }
  0x71   : > { %p3390_p4 = scmp.lt.s32.totalorder %s3388_s15, %s3381_s20 }
  0x72   : > { %p3384_p10 = pnand %p3382_p9, %p3895_p8 }
  0x73   : > { %p3391_p1 = por %p3390_p4, %p3389_p12 }
  0x74   : > { %p3385_p11 = pneg %p3384_p10 }
  0x76   : > { %p3392_p3 = pnand %p3391_p1, %p3385_p11 }
  0x78   : > { %3395 = shalt.err (!%p3392_p3)
}
  0x79   : > { %2951 = dma.hbm_to_vmem [thread:$0]  (!%p3881_p6), %s4476_s7, 16, %s428_s24, [#allocation15]  }
  0x7a   : > { %s3396_s23 = scalar_lea.hbm %s4478_s9, 4096 }
  0x7b   : > { %p3397_p13 = scmp.ne.s32.totalorder %s4478_s9, %s3396_s23  ;;  %p3403_p3 = scmp.lt.u32.totalorder %s3396_s23, %s4478_s9 }
  0x7d   : > { %p3399_p0 = pnand %p3397_p13, %p3895_p8 }
  0x7f   : > { %p3400_p1 = pneg %p3399_p0 }
  0x81   : > { %p3405_p2 = pnand %p3403_p3, %p3400_p1 }
  0x83   : > { %3408 = shalt.err (!%p3405_p2)
}
  0x84   : > { %s3409_s17 = scalar_lea.vmem %s449_s19, 4096  ;;  %p3417_p10 = scmp.lt.s32.totalorder %s449_s19, %s449_s19 }
  0x85   : > { %p3410_p5 = scmp.ne.s32.totalorder %s449_s19, %s3409_s17  ;;  %p3418_p11 = scmp.lt.s32.totalorder %s3409_s17, %s3409_s17 }
  0x87   : > { %p3412_p7 = pnand %p3410_p5, %p3895_p8  ;;  %p3419_p12 = por %p3418_p11, %p3417_p10 }
  0x89   : > { %p3413_p9 = pneg %p3412_p7 }
  0x8b   : > { %p3420_p4 = pnand %p3419_p12, %p3413_p9 }
  0x8d   : > { %3423 = shalt.err (!%p3420_p4)
}
  0x8e   : > { %s3751_s24 = smov 256   ;;  %s3752_s20 = smov 16  }
  0x8f   : > { %2957 = dma.hbm_to_vmem [thread:$0]  (!%p3881_p6), %s4478_s9, 4096, %s449_s19, [#allocation18], %s3751_s24, %s3751_s24, %s3752_s20  }
  0x90   : > { %s3753_s13 = smov [#allocation20]   ;;  %s3754_s14 = smov [#allocation7]  }
  0x91   : > { %s472_s25 = sshll.u32 %s3753_s13, 4  ;;  %s368_s23 = sshll.u32 %s3754_s14, 4  ;;  %s473_s25 = int_to_ptr.vmem [resolvable:$true] %s472_s25  ;;  %s369_s23 = int_to_ptr.vmem [resolvable:$true] %s368_s23 }
  0x92   : > { %s3424_s22 = scalar_lea.hbm %s4480_s11, 4096 }
  0x93   : > { %p3425_p13 = scmp.ne.s32.totalorder %s4480_s11, %s3424_s22  ;;  %p3431_p3 = scmp.lt.u32.totalorder %s3424_s22, %s4480_s11 }
  0x95   : > { %p3427_p0 = pnand %p3425_p13, %p3895_p8 }
  0x97   : > { %p3428_p1 = pneg %p3427_p0 }
  0x99   : > { %p3433_p2 = pnand %p3431_p3, %p3428_p1 }
  0x9b   : > { %3436 = shalt.err (!%p3433_p2)
}
  0x9c   : > { %s3437_s19 = scalar_lea.vmem %s473_s25, 4096  ;;  %p3445_p10 = scmp.lt.s32.totalorder %s473_s25, %s473_s25 }
  0x9d   : > { %p3438_p5 = scmp.ne.s32.totalorder %s473_s25, %s3437_s19  ;;  %p3446_p11 = scmp.lt.s32.totalorder %s3437_s19, %s3437_s19 }
  0x9f   : > { %p3440_p7 = pnand %p3438_p5, %p3895_p8  ;;  %p3447_p12 = por %p3446_p11, %p3445_p10 }
  0xa1   : > { %p3441_p9 = pneg %p3440_p7 }
  0xa3   : > { %p3448_p4 = pnand %p3447_p12, %p3441_p9 }
  0xa5   : > { %3451 = shalt.err (!%p3448_p4)
}
  0xa6   : > { %s4506_s24 = smov 4   ;;  %s4507_s20 = smov 64  }
  0xa7   : > { %2963 = dma.hbm_to_vmem [thread:$0]  (!%p3881_p6), %s4480_s11, 4096, %s473_s25, [#allocation21], %s4507_s20, %s4507_s20, %s4506_s24  }
  0xa8   : > { %s3452_s13 = scalar_lea.hbm %s4471_s2, 16 }
  0xa9   : > { %p3453_p13 = scmp.ne.s32.totalorder %s4471_s2, %s3452_s13  ;;  %p3459_p3 = scmp.lt.u32.totalorder %s3452_s13, %s4471_s2 }
  0xab   : > { %p3455_p0 = pnand %p3453_p13, %p3895_p8 }
  0xad   : > { %p3456_p1 = pneg %p3455_p0 }
  0xaf   : > { %p3461_p2 = pnand %p3459_p3, %p3456_p1 }
  0xb1   : > { %3464 = shalt.err (!%p3461_p2)
}
  0xb2   : > { %s3465_s30 = scalar_lea.vmem %s369_s23, 16  ;;  %s3472_s25 = scalar_lea.vmem %s369_s23, 32 }
  0xb3   : > { %p3466_p5 = scmp.ne.s32.totalorder %s369_s23, %s3465_s30  ;;  %p3473_p10 = scmp.lt.s32.totalorder %s369_s23, %s369_s23 }
  0xb4   : > { %p3474_p11 = scmp.lt.s32.totalorder %s3472_s25, %s3465_s30 }
  0xb5   : > { %p3468_p7 = pnand %p3466_p5, %p3895_p8 }
  0xb6   : > { %p3475_p12 = por %p3474_p11, %p3473_p10 }
  0xb7   : > { %p3469_p9 = pneg %p3468_p7 }
  0xb9   : > { %p3476_p4 = pnand %p3475_p12, %p3469_p9 }
  0xbb   : > { %3479 = shalt.err (!%p3476_p4)
}
  0xbc   : > { %2936 = dma.hbm_to_vmem [thread:$0]  (!%p3881_p6), %s4471_s2, 16, %s369_s23, [#allocation6]  }
  0xbd   : > { %s3755_s24 = smov [#allocation10]   ;;  %s3756_s0 = smov [#allocation13]  }
  0xbe   : > { %s392_s20 = sshll.u32 %s3755_s24, 4  ;;  %s416_s1 = sshll.u32 %s3756_s0, 4  ;;  %s393_s20 = int_to_ptr.vmem [resolvable:$true] %s392_s20  ;;  %s417_s1 = int_to_ptr.vmem [resolvable:$true] %s416_s1 }
  0xbf   : > { %s3480_s13 = scalar_lea.hbm %s4473_s4, 48 }
  0xc0   : > { %p3481_p13 = scmp.ne.s32.totalorder %s4473_s4, %s3480_s13  ;;  %p3487_p3 = scmp.lt.u32.totalorder %s3480_s13, %s4473_s4 }
  0xc2   : > { %p3483_p0 = pnand %p3481_p13, %p3895_p8 }
  0xc4   : > { %p3484_p1 = pneg %p3483_p0 }
  0xc6   : > { %p3489_p2 = pnand %p3487_p3, %p3484_p1 }
  0xc8   : > { %3492 = shalt.err (!%p3489_p2)
}
  0xc9   : > { %s3493_s23 = scalar_lea.vmem %s393_s20, 48  ;;  %s3500_s30 = scalar_lea.vmem %s393_s20, 64 }
  0xca   : > { %p3494_p5 = scmp.ne.s32.totalorder %s393_s20, %s3493_s23  ;;  %p3501_p10 = scmp.lt.s32.totalorder %s393_s20, %s393_s20 }
  0xcb   : > { %p3502_p11 = scmp.lt.s32.totalorder %s3500_s30, %s3493_s23 }
  0xcc   : > { %p3496_p7 = pnand %p3494_p5, %p3895_p8 }
  0xcd   : > { %p3503_p12 = por %p3502_p11, %p3501_p10 }
  0xce   : > { %p3497_p9 = pneg %p3496_p7 }
  0xd0   : > { %p3504_p4 = pnand %p3503_p12, %p3497_p9 }
  0xd2   : > { %3507 = shalt.err (!%p3504_p4)
}
  0xd3   : > { %2942 = dma.hbm_to_vmem [thread:$0]  (!%p3881_p6), %s4473_s4, 48, %s393_s20, [#allocation9]  }
  0xd4   : > { %s3508_s0 = scalar_lea.hbm %s4475_s6, 16 }
  0xd5   : > { %p3509_p13 = scmp.ne.s32.totalorder %s4475_s6, %s3508_s0  ;;  %p3515_p3 = scmp.lt.u32.totalorder %s3508_s0, %s4475_s6 }
  0xd7   : > { %p3511_p0 = pnand %p3509_p13, %p3895_p8 }
  0xd9   : > { %p3512_p1 = pneg %p3511_p0 }
  0xdb   : > { %p3517_p2 = pnand %p3515_p3, %p3512_p1 }
  0xdd   : > { %3520 = shalt.err (!%p3517_p2)
}
  0xde   : > { %s3521_s29 = scalar_lea.vmem %s417_s1, 16  ;;  %s3528_s20 = scalar_lea.vmem %s417_s1, 32 }
  0xdf   : > { %p3522_p5 = scmp.ne.s32.totalorder %s417_s1, %s3521_s29  ;;  %p3529_p10 = scmp.lt.s32.totalorder %s417_s1, %s417_s1 }
  0xe0   : > { %p3530_p11 = scmp.lt.s32.totalorder %s3528_s20, %s3521_s29 }
  0xe1   : > { %p3524_p7 = pnand %p3522_p5, %p3895_p8 }
  0xe2   : > { %p3531_p12 = por %p3530_p11, %p3529_p10 }
  0xe3   : > { %p3525_p9 = pneg %p3524_p7 }
  0xe5   : > { %p3532_p4 = pnand %p3531_p12, %p3525_p9 }
  0xe7   : > { %3535 = shalt.err (!%p3532_p4)
}
  0xe8   : > { %2948 = dma.hbm_to_vmem [thread:$0]  (!%p3881_p6), %s4475_s6, 16, %s417_s1, [#allocation12]  }
  0xe9   : > { %s3757_s23 = smov [#allocation16]   ;;  %s3758_s25 = smov [#allocation19]  }
  0xea   : > { %s438_s30 = sshll.u32 %s3757_s23, 4  ;;  %s462_s17 = sshll.u32 %s3758_s25, 4  ;;  %s439_s30 = int_to_ptr.vmem [resolvable:$true] %s438_s30  ;;  %s463_s17 = int_to_ptr.vmem [resolvable:$true] %s462_s17 }
  0xeb   : > { %s3536_s0 = scalar_lea.hbm %s4477_s8, 16 }
  0xec   : > { %p3537_p13 = scmp.ne.s32.totalorder %s4477_s8, %s3536_s0  ;;  %p3543_p3 = scmp.lt.u32.totalorder %s3536_s0, %s4477_s8 }
  0xee   : > { %p3539_p0 = pnand %p3537_p13, %p3895_p8 }
  0xf0   : > { %p3540_p1 = pneg %p3539_p0 }
  0xf2   : > { %p3545_p2 = pnand %p3543_p3, %p3540_p1 }
  0xf4   : > { %3548 = shalt.err (!%p3545_p2)
}
  0xf5   : > { %s3549_s1 = scalar_lea.vmem %s439_s30, 16  ;;  %s3556_s29 = scalar_lea.vmem %s439_s30, 32 }
  0xf6   : > { %p3550_p5 = scmp.ne.s32.totalorder %s439_s30, %s3549_s1  ;;  %p3557_p10 = scmp.lt.s32.totalorder %s439_s30, %s439_s30 }
  0xf7   : > { %p3558_p11 = scmp.lt.s32.totalorder %s3556_s29, %s3549_s1 }
  0xf8   : > { %p3552_p7 = pnand %p3550_p5, %p3895_p8 }
  0xf9   : > { %p3559_p12 = por %p3558_p11, %p3557_p10 }
  0xfa   : > { %p3553_p9 = pneg %p3552_p7 }
  0xfc   : > { %p3560_p4 = pnand %p3559_p12, %p3553_p9 }
  0xfe   : > { %3563 = shalt.err (!%p3560_p4)
}
  0xff   : > { %2954 = dma.hbm_to_vmem [thread:$0]  (!%p3881_p6), %s4477_s8, 16, %s439_s30, [#allocation15]  }
 0x100   : > { %s3564_s25 = scalar_lea.hbm %s4479_s10, 64 }
 0x101   : > { %p3565_p13 = scmp.ne.s32.totalorder %s4479_s10, %s3564_s25  ;;  %p3571_p3 = scmp.lt.u32.totalorder %s3564_s25, %s4479_s10 }
 0x103   : > { %p3567_p0 = pnand %p3565_p13, %p3895_p8 }
 0x105   : > { %p3568_p1 = pneg %p3567_p0 }
 0x107   : > { %p3573_p2 = pnand %p3571_p3, %p3568_p1 }
 0x109   : > { %3576 = shalt.err (!%p3573_p2)
}
 0x10a   : > { %s3577_s3 = scalar_lea.vmem %s463_s17, 64  ;;  %p3585_p10 = scmp.lt.s32.totalorder %s463_s17, %s463_s17 }
 0x10b   : > { %p3578_p5 = scmp.ne.s32.totalorder %s463_s17, %s3577_s3  ;;  %p3586_p11 = scmp.lt.s32.totalorder %s3577_s3, %s3577_s3 }
 0x10d   : > { %p3580_p7 = pnand %p3578_p5, %p3895_p8  ;;  %p3587_p12 = por %p3586_p11, %p3585_p10 }
 0x10f   : > { %p3581_p9 = pneg %p3580_p7 }
 0x111   : > { %p3588_p4 = pnand %p3587_p12, %p3581_p9 }
 0x113   : > { %3591 = shalt.err (!%p3588_p4)
}
 0x114   : > { %2960 = dma.hbm_to_vmem [thread:$0]  (!%p3881_p6), %s4479_s10, 64, %s463_s17, [#allocation18]  }
 0x115   : > { %s3759_s14 = smov [#allocation22]   ;;  %s3592_s21 = scalar_lea.hbm %s4481_s12, 16 }
 0x116   : > { %s486_s1 = sshll.u32 %s3759_s14, 4  ;;  %p3593_p13 = scmp.ne.s32.totalorder %s4481_s12, %s3592_s21  ;;  %s487_s1 = int_to_ptr.vmem [resolvable:$true] %s486_s1 }
 0x117   : > { %p3599_p3 = scmp.lt.u32.totalorder %s3592_s21, %s4481_s12 }
 0x118   : > { %p3595_p0 = pnand %p3593_p13, %p3895_p8 }
 0x11a   : > { %p3596_p1 = pneg %p3595_p0 }
 0x11c   : > { %p3601_p2 = pnand %p3599_p3, %p3596_p1 }
 0x11e   : > { %3604 = shalt.err (!%p3601_p2)
}
 0x11f   : > { %s3605_s17 = scalar_lea.vmem %s487_s1, 16  ;;  %s3612_s24 = scalar_lea.vmem %s487_s1, 32 }
 0x120   : > { %p3606_p5 = scmp.ne.s32.totalorder %s487_s1, %s3605_s17  ;;  %p3613_p10 = scmp.lt.s32.totalorder %s487_s1, %s487_s1 }
 0x121   : > { %p3614_p11 = scmp.lt.s32.totalorder %s3612_s24, %s3605_s17 }
 0x122   : > { %p3608_p7 = pnand %p3606_p5, %p3895_p8 }
 0x123   : > { %p3615_p12 = por %p3614_p11, %p3613_p10 }
 0x124   : > { %p3609_p9 = pneg %p3608_p7 }
 0x126   : > { %p3616_p4 = pnand %p3615_p12, %p3609_p9 }
 0x128   : > { %3619 = shalt.err (!%p3616_p4)
}
 0x129   : > { %s4508_s16 = sld [smem:[#allocation32_spill]]  ;;  %s4509_s3 = sld [smem:[#allocation33_spill]] }
 0x12a   : > { %2966 = dma.hbm_to_vmem [thread:$0]  (!%p3881_p6), %s4481_s12, 16, %s487_s1, [#allocation21]  }
 0x12b   : > { %s2562_s30 = sadd.s32 4294967294, %s3740_s28   ;;  %s4133_s18 = sadd.s32 1, %s3740_s28  }
 0x12c   : > { %s39_s13 = ssub.s32 %s3740_s28, %s4133_s18  ;;  %s42_s14 = sadd.s32 1, %s3736_s27 }
 0x12d   : > { %p40_p8 = scmp.eq.s32.totalorder %s39_s13, 0  ;;  %p49_p13 = scmp.ne.s32.totalorder %s3736_s27, %s3732_s26 }
 0x12e   : > { %p50_p0 = scmp.eq.s32.totalorder %s3740_s28, 0  ;;  %p337_p7 = scmp.eq.s32.totalorder %s2562_s30, 1 }
 0x12f   : > { %p55_p1 = scmp.ne.s32.totalorder %s3732_s26, %s4508_s16  ;;  %p4511_p2 = scmp.eq.s32.totalorder %s4509_s3, 0 }
 0x130   : > { %s4144_s29 = scalar_select %p40_p8, %s3736_s27, %s42_s14  }
 0x131   : > { %p4146_p3 = por %p50_p0, %p49_p13  ;;  %p4152_p6 = por %p4511_p2, %p55_p1 }
 0x132   : > { %p331_p5 = scmp.eq.s32.totalorder %s4509_s3, 1  ;;  %p2987_p9 = scmp.lt.s32.totalorder %s3740_s28, 2 }
 0x133   : > { %s497_s21 = sand.u32 1, %s3736_s27   ;;  %p4163_p11 = por %p337_p7, %p55_p1 }
 0x134   : > { %p4159_p10 = por %p331_p5, %p49_p13  ;;  %s2577_s25 = sshll.u32 %s497_s21, 4 }
 0x135   : > { %s4514_s23 = scalar_select %p4163_p11, 1, 0 }
 0x136   : > { %s4513_s22 = scalar_select %p4159_p10, 1, 0 }
 0x137   : > { %s2710_s19 = sshll.u32 %s3740_s28, 8  ;;  %s4515_s0 = sld [smem:[#allocation35_spill]] }
 0x138   : > { %s501_s16 = scalar_lea.vmem [#allocation2], %s2577_s25  ;;  %p4177_p12 = pnand %p2987_p9, %p4146_p3 }
 0x139   : > { %s508_s3 = sshll.u32 %s501_s16, 4  ;;  %s4181_s13 = scalar_lea.sflag [#allocation3], %s497_s21  ;;  %s4173_s3 = int_to_ptr.vmem [resolvable:$true] %s508_s3 }
 0x13a   : > { %p3622_p8 = pneg %p4177_p12 }
 0x13d   : > { %s4171_s15 = scalar_lea.hbm %s4515_s0, %s2710_s19  ;;  %s3625_s20 = scalar_lea.hbm %s4515_s0, 512 }
 0x13e   : > { %s3620_s14 = scalar_lea.hbm %s4171_s15, 256  ;;  %p3626_p1 = scmp.lt.u32.totalorder %s4171_s15, %s4515_s0 }
 0x13f   : > { %p3621_p4 = scmp.ne.s32.totalorder %s4171_s15, %s3620_s14  ;;  %p3627_p3 = scmp.lt.u32.totalorder %s3625_s20, %s3620_s14 }
 0x140   : > { %p3629_p5 = scmp.lt.u32.totalorder %s3620_s14, %s4171_s15 }
 0x141   : > { %p3623_p13 = pnand %p3622_p8, %p3621_p4  ;;  %p3628_p2 = por %p3627_p3, %p3626_p1 }
 0x143   : > { %p3624_p0 = pneg %p3623_p13  ;;  %p3630_p7 = por %p3629_p5, %p3628_p2 }
 0x145   : > { %p3631_p9 = pnand %p3630_p7, %p3624_p0 }
 0x147   : > { %3634 = shalt.err (!%p3631_p9)
}
 0x148   : > { %s3635_s21 = scalar_lea.vmem %s4173_s3, 256  ;;  %s3760_s16 = smov [#allocation2]  }
 0x149   : > { %p3636_p4 = scmp.ne.s32.totalorder %s4173_s3, %s3635_s21  ;;  %s3640_s25 = sshll.u32 %s3760_s16, 4  ;;  %s3641_s25 = int_to_ptr.vmem [resolvable:$false] %s3640_s25 }
 0x14a   : > { %s3642_s19 = scalar_lea.vmem %s3641_s25, 512  ;;  %p3643_p10 = scmp.lt.s32.totalorder %s4173_s3, %s3641_s25 }
 0x14b   : > { %p3638_p13 = pnand %p3636_p4, %p3622_p8  ;;  %p3644_p1 = scmp.lt.s32.totalorder %s3642_s19, %s3635_s21 }
 0x14d   : > { %p3639_p11 = pneg %p3638_p13  ;;  %p3645_p3 = por %p3644_p1, %p3643_p10 }
 0x14f   : > { %p3646_p2 = pnand %p3645_p3, %p3639_p11 }
 0x151   : > { %3649 = shalt.err (!%p3646_p2)
}
 0x152   : > { %s3761_s14 = smov 128   ;;  %s3762_s20 = smov 8  }
 0x153   : > { %2970 = dma.hbm_to_vmem [thread:$0]  (!%p4177_p12), %s4171_s15, 256, %s4173_s3, %s4181_s13, %s3761_s14, %s3761_s14, %s3762_s20  }
 0x154   : > { %s4517_s17 = sld [smem:[#allocation34_spill]] }
 0x15a   : > { %p4518_p8 = scmp.ne.s32.totalorder %s4517_s17, 0 }
 0x15b   : > { %s4212_s24 = sand.u32 (!%p4518_p8), 1, %s3732_s26  }
 0x15c   : > { %520 = sbr.rel (%p4518_p8) target bundleno = 2939 (0xb7b), region = 72  ;;  %s2581_s21 = sshll.u32 (!%p4518_p8), %s4212_s24, 4 }
 0x15d   : > { %s523_s16 = scalar_lea.sflag (!%p4518_p8), [#allocation3], %s4212_s24  ;;  %s4218_s25 = scalar_lea.vmem (!%p4518_p8), [#allocation2], %s2581_s21 }
 0x163   : > { %3695 = dma.done.wait (%p4152_p6), %s523_s16, 256  }
 0x164   : > { %3697 = vsyncadd (%p4152_p6), %s523_s16, 4294967040  ;;  %s4519_s15 = sld [smem:[#allocation33_spill]] }
 0x16a   : > { %p4520_p10 = scmp.eq.s32.totalorder %s4519_s15, 0 }
 0x16c   : > { %3699 = dma.done.wait (%p4520_p10), [#allocation6], 32   ;;  %p4521_p11 = pmov %p4520_p10 }
 0x16d   : > { %p4522_p12 = pmov %p4520_p10 }
 0x16e   : > { %3701 = vsyncadd (%p4521_p11), [#allocation6], 4294967264 }
 0x16f   : > { %3703 = dma.done.wait (%p4522_p12), [#allocation9], 3120   ;;  %p4523_p0 = pmov %p4520_p10 }
 0x171   : > { %3705 = vsyncadd (%p4523_p0), [#allocation9], 4294964176  ;;  %p4524_p5 = pmov %p4523_p0 }
 0x172   : > { %p4525_p7 = pmov %p4523_p0 }
 0x173   : > { %3707 = dma.done.wait (%p4524_p5), [#allocation12], 1040  }
 0x174   : > { %3709 = vsyncadd (%p4525_p7), [#allocation12], 4294966256  ;;  %p4526_p6 = pmov %p4523_p0 }
 0x175   : > { %p4527_p9 = pmov %p4523_p0 }
 0x176   : > { %3711 = dma.done.wait (%p4526_p6), [#allocation15], 32  }
 0x177   : > { %3713 = vsyncadd (%p4527_p9), [#allocation15], 4294967264  ;;  %p4528_p4 = pmov %p4523_p0 }
 0x178   : > { %p4529_p13 = pmov %p4523_p0 }
 0x179   : > { %3715 = dma.done.wait (%p4528_p4), [#allocation18], 4160  }
 0x17a   : > { %3717 = vsyncadd (%p4529_p13), [#allocation18], 4294963136  ;;  %p4530_p1 = pmov %p4523_p0 }
 0x17b   : > { %p4531_p3 = pmov %p4523_p0 }
 0x17c   : > { %3719 = dma.done.wait (%p4530_p1), [#allocation21], 4112  }
 0x17d   : > { %3721 = vsyncadd (%p4531_p3), [#allocation21], 4294963184  ;;  %v618_v0 = vld [vmem:[%s4218_s25] sm:$0xff]  ;;  %v619_v1 = vld [vmem:[%s4218_s25 + $0x8] sm:$0xff]  ;;  %v3763_v4 = vmov 0.0   ;;  %v3764_v30 = vmov 0   ;;  %v696_v53 = vlaneseq }
 0x17e   : > { %622 = vadd.xlane.f32.xlu0 %v618_v0  ;;  %v3106_v2 = vld [vmem:[#allocation8 + $0x4] ss:$12 sps:$4 sm:$0xff]   ;;  %v3108_v3 = vld [vmem:[#allocation8] ss:$12 sps:$4 sm:$0xff]   ;;  %2790 = vmatprep.subr.bf16.mxu1 %v3763_v4  ;;  %v3109_v5 = vld [vmem:[#allocation8 + $0x8] ss:$12 sps:$4 sm:$0xff]  }
 0x17f   : > { %v3110_v6 = vld [vmem:[#allocation8 + $0x1c] ss:$12 sps:$4 sm:$0xff]   ;;  %839 = vmatprep.subr.bf16.mxu0 %v3106_v2  ;;  %2791 = vmatpush3.bf16.msra.mxu1 %v3109_v5  ;;  %v3112_v15 = vld [vmem:[#allocation8 + $0x18] ss:$12 sps:$4 sm:$0xff]   ;;  %v3113_v16 = vld [vmem:[#allocation8 + $0x20] ss:$12 sps:$4 sm:$0xff]  }
 0x180   : > { %840 = vmatpush1.bf16.msra.mxu0 %v3108_v3  ;;  %2792 = vmatprep.subr.bf16.mxu1 %v3763_v4  ;;  %v3114_v17 = vld [vmem:[#allocation8 + $0x34] ss:$12 sps:$4 sm:$0xff]   ;;  %v3116_v18 = vld [vmem:[#allocation8 + $0x30] ss:$12 sps:$4 sm:$0xff]   ;;  %v3117_v19 = vld [vmem:[#allocation8 + $0x38] ss:$12 sps:$4 sm:$0xff]  }
 0x181   : > { %841 = vmatprep.subr.bf16.mxu0 %v3110_v6  ;;  %v3118_v20 = vld [vmem:[#allocation8 + $0x4c] ss:$12 sps:$4 sm:$0xff]   ;;  %v3120_v21 = vld [vmem:[#allocation8 + $0x48] ss:$12 sps:$4 sm:$0xff]   ;;  %v3121_v22 = vld [vmem:[#allocation8 + $0x50] ss:$12 sps:$4 sm:$0xff]   ;;  %871 = vmatprep.mubr.bf16.mxu0 %v3764_v30 }
 0x182   : > { %624 = vadd.xlane.f32.xlu0 %v619_v1  ;;  %v3122_v23 = vld [vmem:[#allocation8 + $0x64] ss:$12 sps:$4 sm:$0xff]   ;;  %v3124_v24 = vld [vmem:[#allocation8 + $0x60] ss:$12 sps:$4 sm:$0xff]   ;;  %v3125_v25 = vld [vmem:[#allocation8 + $0x68] ss:$12 sps:$4 sm:$0xff]  }
 0x183   : > { %2793 = vmatpush3.bf16.msra.mxu1 %v3113_v16  ;;  %v3126_v26 = vld [vmem:[#allocation8 + $0x7c] ss:$12 sps:$4 sm:$0xff]   ;;  %v3128_v27 = vld [vmem:[#allocation8 + $0x78] ss:$12 sps:$4 sm:$0xff]   ;;  %v3129_v28 = vld [vmem:[#allocation8 + $0x80] ss:$12 sps:$4 sm:$0xff]  }
 0x184   : > { %842 = vmatpush1.bf16.msra.mxu0 %v3112_v15  ;;  %2794 = vmatprep.subr.bf16.mxu1 %v3763_v4  ;;  %v3130_v29 = vld [vmem:[#allocation8 + $0x94] ss:$12 sps:$4 sm:$0xff]   ;;  %vm3765_vm0 = vmmov 0   ;;  %v3132_v31 = vld [vmem:[#allocation8 + $0x90] ss:$12 sps:$4 sm:$0xff]   ;;  %v4278_v54 = vshrl.u32 %v696_v53, 7 }
 0x185   : > { %843 = vmatprep.subr.bf16.mxu0 %v3114_v17  ;;  %2806 = vmatprep.mubr.msk.bf16.mxu1 %vm3765_vm0, %v3763_v4  ;;  %v3133_v32 = vld [vmem:[#allocation8 + $0x98] ss:$12 sps:$4 sm:$0xff]   ;;  %v3136_v34 = vld [vmem:[#allocation8 + $0xa8] ss:$12 sps:$4 sm:$0xff]   ;;  %v3137_v35 = vld [vmem:[#allocation8 + $0xb0] ss:$12 sps:$4 sm:$0xff]  }
 0x186   : > { %v3134_v33 = vld [vmem:[#allocation8 + $0xac] ss:$12 sps:$4 sm:$0xff]   ;;  %v2595_v44 = vld [vmem:[#allocation5] ss:$0 sm:$0xff]  ;;  %v2596_v48 = vld [vmem:[#allocation7] ss:$0 sm:$0xff] }
 0x187   : > { %2795 = vmatpush3.bf16.msra.mxu1 %v3117_v19  ;;  %v698_v55 = vsub.s32 0, %v4278_v54  ;;  %v694_v56 = vld [vmem:[#allocation10] sm:$0x7]  ;;  %v706_v57 = vsub.s32 2, %v4278_v54  ;;  %v702_v58 = vsub.s32 1, %v4278_v54  ;;  %s3766_s1 = smov 96  }
 0x188   : > { %844 = vmatpush1.bf16.msra.mxu0 %v3116_v18  ;;  %2796 = vmatprep.subr.bf16.mxu1 %v3763_v4  ;;  %vm999_vm1 = vcmask 261120   ;;  %s3767_s3 = smov 64   ;;  %s3768_s30 = smov 32   ;;  %vm1207_vm3 = vcmask 130048   ;;  %vm1506_vm5 = vcmask 523264   ;;  %vm1509_vm6 = vcmask 785408  }
 0x189   : > { %845 = vmatprep.subr.bf16.mxu0 %v3118_v20  ;;  %v699_v59 = vrot.slane %v694_v56, %v698_v55  ;;  %v707_v60 = vrot.slane %v694_v56, %v706_v57  ;;  %v703_v63 = vrot.slane %v694_v56, %v702_v58  ;;  %v1190_v56 = vadd.s32 8, %v4278_v54  ;;  %s616_s13 = scalar_lea.vmem [#allocation23], %s2581_s21  ;;  %s2711_s14 = sshll.u32 %s4519_s15, 8 }
 0x18a   : > { %s2375_s19 = sshll.u32 %s616_s13, 4  ;;  %s4532_s16 = sld [smem:[#allocation38_spill]]  ;;  %s4419_s19 = int_to_ptr.vmem [resolvable:$true] %s2375_s19 }
 0x18b   : > { %2797 = vmatpush3.bf16.msra.mxu1 %v3121_v22  ;;  %s2362_s21 = scalar_lea.sflag [#allocation4], %s4212_s24  ;;  %p4533_p8 = scmp.ne.s32.totalorder %s4513_s22, 0 }
 0x18c   : > { %846 = vmatpush1.bf16.msra.mxu0 %v3120_v21  ;;  %2798 = vmatprep.subr.bf16.mxu1 %v3763_v4  ;;  %s3769_s15 = smov [#allocation23]  }
 0x18d   : > { %847 = vmatprep.subr.bf16.mxu0 %v3122_v23 }
 0x18f   : > { %2799 = vmatpush3.bf16.msra.mxu1 %v3125_v25 }
 0x190   : > { %848 = vmatpush1.bf16.msra.mxu0 %v3124_v24  ;;  %2800 = vmatprep.subr.bf16.mxu1 %v3763_v4 }
 0x191   : > { %849 = vmatprep.subr.bf16.mxu0 %v3126_v26 }
 0x193   : > { %2801 = vmatpush3.bf16.msra.mxu1 %v3129_v28 }
 0x194   : > { %850 = vmatpush1.bf16.msra.mxu0 %v3128_v27  ;;  %2802 = vmatprep.subr.bf16.mxu1 %v3763_v4 }
 0x195   : > { %851 = vmatprep.subr.bf16.mxu0 %v3130_v29 }
 0x197   : > { %2803 = vmatpush3.bf16.msra.mxu1 %v3133_v32 }
 0x198   : > { %852 = vmatpush1.bf16.msra.mxu0 %v3132_v31  ;;  %2804 = vmatprep.subr.bf16.mxu1 %v3763_v4 }
 0x199   : > { %853 = vmatprep.subr.bf16.mxu0 %v3134_v33 }
 0x19b   : > { %2805 = vmatpush3.bf16.msra.mxu1 %v3137_v35 }
 0x19c   : > { %854 = vmatpush1.bf16.msra.mxu0 %v3136_v34  ;;  %2810 = vmatprep.subr.bf16.mxu1 %v3763_v4 }
 0x19d   : > { %2834 = vmatprep.subr.bf16.mxu0 %v3763_v4 }
 0x20b   : > { %v623_v7 = vpop.xlane.xlu0 %622 }
 0x20c   : > { %v627_v8 = vmul.f32 0.0078125, %v623_v7 }
 0x20e   : > { %v4252_v9 = vsub.f32 %v618_v0, %v627_v8 }
 0x20f   : > { %v625_v10 = vpop.xlane.xlu0 %624 }
 0x210   : > { %v628_v11 = vmul.f32 0.0078125, %v625_v10  ;;  %v631_v12 = vmul.f32 %v4252_v9, %v4252_v9 }
 0x212   : > { %v4256_v13 = vsub.f32 %v619_v1, %v628_v11  ;;  %633 = vadd.xlane.f32.xlu1 %v631_v12 }
 0x214   : > { %v632_v14 = vmul.f32 %v4256_v13, %v4256_v13 }
 0x216   : > { %635 = vadd.xlane.f32.xlu1 %v632_v14 }
 0x29f   : > { %v634_v36 = vpop.xlane.xlu1 %633 }
 0x2a0   : > { %v637_v37 = vmul.f32 0.0078125, %v634_v36 }
 0x2a2   : > { %v639_v38 = vadd.f32 1e-05, %v637_v37 }
 0x2a3   : > { %v636_v39 = vpop.xlane.xlu1 %635 }
 0x2a4   : > { %3226 = vrsqrt.f32 %v639_v38  ;;  %v638_v40 = vmul.f32 0.0078125, %v636_v39 }
 0x2a6   : > { %v640_v41 = vadd.f32 1e-05, %v638_v40 }
 0x2a8   : > { %3228 = vrsqrt.f32 %v640_v41 }
 0x2ae   : > { %v3227_v42 = vpop.eup %3226 }
 0x2af   : > { %v643_v43 = vmul.f32 %v3227_v42, %v4252_v9 }
 0x2b1   : > { %v651_v47 = vmul.f32 %v2595_v44, %v643_v43 }
 0x2b2   : > { %v3229_v45 = vpop.eup %3228 }
 0x2b3   : > { %v644_v46 = vmul.f32 %v3229_v45, %v4256_v13  ;;  %v659_v50 = vadd.f32 %v2596_v48, %v651_v47 }
 0x2b5   : > { %v652_v49 = vmul.f32 %v2595_v44, %v644_v46 }
 0x2b7   : > { %v660_v51 = vadd.f32 %v2596_v48, %v652_v49 }
 0x2b9   : > { %v661_v52 = vpack.c.bf16 %v660_v51, %v659_v50 }
 0x2bb   : > { %872 = vmatmul.mubr.bf16.vlgmr.msra.gmra.mrb[0].mxu0 %v661_v52  ;;  %2807 = vmatmul.mubr.bf16.vlgmr.msra.gmra.mrb[0].mxu1 %v661_v52  ;;  %v1192_v52 = vand.u32 127, %v696_v53 }
 0x2bc   : > { %2812 = vmatprep.mubr.msk.bf16.mxu1 %vm3765_vm0, %v3763_v4  ;;  %2836 = vmatprep.mubr.msk.bf16.mxu0 %vm3765_vm0, %v3763_v4 }
 0x2bd   : > { %vm1193_vm2 = vcmp.ge.s32.totalorder %v4278_v54, %v1192_v52  ;;  %vm1194_vm4 = vcmp.ge.s32.totalorder %v1190_v56, %v1192_v52 }
 0x38e   : > { %v873_v61 = vpop.f32.mrb[0].mxu0  ;;  %v916_v62 = vpop.f32.mrb[0].mxu1 }
 0x38f   : > { %v874_v0 = vadd.f32 %v873_v61, %v699_v59  ;;  %v875_v1 = vpop.f32.mrb[1].mxu0  ;;  %v2808_v2 = vpop.f32.mrb[1].mxu1  ;;  %v917_v6 = vadd.f32 %v916_v62, %v707_v60 }
 0x390   : > { %v877_v3 = vpop.f32.mrb[2].mxu0  ;;  %v919_v5 = vpop.f32.mrb[2].mxu1  ;;  %v876_v12 = vadd.f32 %v875_v1, %v703_v63 }
 0x391   : > { %v878_v7 = vadd.f32 %v877_v3, %v699_v59  ;;  %v920_v8 = vadd.f32 %v919_v5, %v707_v60  ;;  %v879_v9 = vpop.f32.mrb[3].mxu0  ;;  %v2809_v10 = vpop.f32.mrb[3].mxu1  ;;  %925 = vrot.lane.b32.xlu1 %v874_v0, %s3766_s1  ;;  %v943_v11 = vmul.f32 0.17677669, %v874_v0 }
 0x392   : > { %v880_v13 = vadd.f32 %v879_v9, %v703_v63 }
 0x393   : > { %v944_v14 = vmul.f32 0.17677669, %v878_v7  ;;  %v1300_v15 = vpack.c.bf16 %v920_v8, %v917_v6  ;;  %v4290_v16 = vpack.i.bf16 %v920_v8, %v917_v6 }
 0x394   : > { %v3061_v17 = vpack.i.bf16 %v880_v13, %v876_v12  ;;  %v995_v18 = vpack.c.bf16 %v880_v13, %v876_v12 }
 0x395   : > { %v991_v19 = vpack.c.bf16 %v944_v14, %v943_v11  ;;  %2835 = vmatpush3.bf16.msra.mxu0 %v1300_v15  ;;  %927 = vrot.lane.b32.xlu1 %v878_v7, %s3766_s1 }
 0x396   : > { %3062 = vrot.lane.b32.xlu0 %v3061_v17, %s3766_s1  ;;  %v1004_v20 = vsel %vm999_vm1, %v995_v18, 0  ;;  %2846 = vmatprep.subr.bf16.mxu0 %v3763_v4 }
 0x397   : > { %2811 = vmatpush3.bf16.xpose.msra.mxu1 %v1004_v20 }
 0x398   : > { %2816 = vmatprep.subr.bf16.mxu1 %v3763_v4 }
 0x399   : > { %3067 = vrot.lane.b32.xlu1 %v3061_v17, %s3767_s3 }
 0x39a   : > { %931 = vrot.lane.b32.xlu0 %v874_v0, %s3767_s3 }
 0x39d   : > { %933 = vrot.lane.b32.xlu1 %v878_v7, %s3767_s3 }
 0x39e   : > { %3072 = vrot.lane.b32.xlu0 %v3061_v17, %s3768_s30  ;;  %2813 = vmatmul.mubr.msk.bf16.vlgmr.msra.gmra.mrb[4].mxu1 %vm999_vm1, %v991_v19 }
 0x39f   : > { %2818 = vmatprep.mubr.msk.bf16.mxu1 %vm3765_vm0, %v3763_v4 }
 0x3a1   : > { %937 = vrot.lane.b32.xlu1 %v874_v0, %s3768_s30 }
 0x3a2   : > { %939 = vrot.lane.b32.xlu0 %v878_v7, %s3768_s30 }
 0x403   : > { %v926_v21 = vpop.permute.xlu1 %925 }
 0x404   : > { %v945_v34 = vmul.f32 0.17677669, %v926_v21 }
 0x407   : > { %v928_v22 = vpop.permute.xlu1 %927 }
 0x408   : > { %v3063_v23 = vpop.permute.xlu0 %3062  ;;  %v946_v33 = vmul.f32 0.17677669, %v928_v22 }
 0x409   : > { %v3065_v24 = vunpack.i.h.bf16 %v3063_v23  ;;  %v3064_v25 = vunpack.i.l.bf16 %v3063_v23 }
 0x40a   : > { %v992_v37 = vpack.c.bf16 %v946_v33, %v945_v34 }
 0x40b   : > { %v996_v26 = vpack.c.bf16 %v3065_v24, %v3064_v25  ;;  %v3068_v27 = vpop.permute.xlu1 %3067 }
 0x40c   : > { %v932_v28 = vpop.permute.xlu0 %931  ;;  %v3070_v29 = vunpack.i.h.bf16 %v3068_v27  ;;  %v3069_v31 = vunpack.i.l.bf16 %v3068_v27 }
 0x40d   : > { %v1051_v32 = vsel %vm999_vm1, %v996_v26, 0  ;;  %v947_v43 = vmul.f32 0.17677669, %v932_v28 }
 0x40e   : > { %2817 = vmatpush3.bf16.xpose.msra.mxu1 %v1051_v32  ;;  %v997_v35 = vpack.c.bf16 %v3070_v29, %v3069_v31 }
 0x40f   : > { %2822 = vmatprep.subr.bf16.mxu1 %v3763_v4  ;;  %v934_v38 = vpop.permute.xlu1 %933 }
 0x410   : > { %v3073_v36 = vpop.permute.xlu0 %3072  ;;  %v1098_v41 = vsel %vm999_vm1, %v997_v35, 0  ;;  %v948_v42 = vmul.f32 0.17677669, %v934_v38 }
 0x411   : > { %v3075_v39 = vunpack.i.h.bf16 %v3073_v36  ;;  %v3074_v40 = vunpack.i.l.bf16 %v3073_v36 }
 0x412   : > { %v993_v45 = vpack.c.bf16 %v948_v42, %v947_v43 }
 0x413   : > { %v998_v44 = vpack.c.bf16 %v3075_v39, %v3074_v40  ;;  %v938_v46 = vpop.permute.xlu1 %937 }
 0x414   : > { %v940_v47 = vpop.permute.xlu0 %939  ;;  %v949_v49 = vmul.f32 0.17677669, %v938_v46 }
 0x415   : > { %2819 = vmatmul.mubr.msk.bf16.vlgmr.msra.gmra.mrb[8].mxu1 %vm999_vm1, %v992_v37  ;;  %v1145_v48 = vsel %vm999_vm1, %v998_v44, 0  ;;  %v950_v50 = vmul.f32 0.17677669, %v940_v47 }
 0x416   : > { %2823 = vmatpush3.bf16.xpose.msra.mxu1 %v1098_v41  ;;  %2824 = vmatprep.mubr.msk.bf16.mxu1 %vm3765_vm0, %v3763_v4 }
 0x417   : > { %2828 = vmatprep.subr.bf16.mxu1 %v3763_v4  ;;  %v994_v51 = vpack.c.bf16 %v950_v50, %v949_v49 }
 0x41d   : > { %2825 = vmatmul.mubr.msk.bf16.vlgmr.msra.gmra.mrb[12].mxu1 %vm999_vm1, %v993_v45 }
 0x41e   : > { %2829 = vmatpush3.bf16.xpose.msra.mxu1 %v1145_v48  ;;  %2830 = vmatprep.mubr.msk.bf16.mxu1 %vm3765_vm0, %v3763_v4 }
 0x41f   : > { %2840 = vmatprep.subr.bf16.mxu1 %v3763_v4 }
 0x425   : > { %2831 = vmatmul.mubr.msk.bf16.vlgmr.msra.gmra.mrb[16].mxu1 %vm999_vm1, %v994_v51 }
 0x426   : > { %2842 = vmatprep.mubr.msk.bf16.mxu1 %vm3765_vm0, %v3763_v4 }
 0x471   : > { %v1040_v59 = vpop.f32.mrb[4].mxu1 }
 0x472   : > { %v1199_v60 = vsel %vm1193_vm2, %v1040_v59, -1e+30  ;;  %v2814_v61 = vpop.f32.mrb[5].mxu1 }
 0x473   : > { %v1043_v62 = vpop.f32.mrb[6].mxu1  ;;  %v1208_v63 = vsel %vm1207_vm3, %v1199_v60, -inf }
 0x474   : > { %v1200_v0 = vsel %vm1194_vm4, %v1043_v62, -1e+30  ;;  %1209 = vmax.xlane.f32.xlu1 %v1208_v63  ;;  %v2815_v1 = vpop.f32.mrb[7].mxu1 }
 0x475   : > { %v1211_v53 = vsel %vm1207_vm3, %v1200_v0, -inf }
 0x476   : > { %1212 = vmax.xlane.f32.xlu0 %v1211_v53 }
 0x4e8   : > { %v1087_v2 = vpop.f32.mrb[8].mxu1 }
 0x4e9   : > { %v1201_v3 = vsel %vm1193_vm2, %v1087_v2, -1e+30  ;;  %v2820_v5 = vpop.f32.mrb[9].mxu1 }
 0x4ea   : > { %v1090_v6 = vpop.f32.mrb[10].mxu1  ;;  %v1214_v7 = vsel %vm1207_vm3, %v1201_v3, -inf }
 0x4eb   : > { %v1202_v8 = vsel %vm1194_vm4, %v1090_v6, -1e+30  ;;  %1215 = vmax.xlane.f32.xlu0 %v1214_v7  ;;  %v2821_v9 = vpop.f32.mrb[11].mxu1 }
 0x4ec   : > { %v1217_v10 = vsel %vm1207_vm3, %v1202_v8, -inf }
 0x4ef   : > { %1218 = vmax.xlane.f32.xlu0 %v1217_v10 }
 0x4f0   : > { %v1134_v11 = vpop.f32.mrb[12].mxu1 }
 0x4f1   : > { %v1203_v12 = vsel %vm1193_vm2, %v1134_v11, -1e+30  ;;  %v2826_v13 = vpop.f32.mrb[13].mxu1 }
 0x4f2   : > { %v1137_v14 = vpop.f32.mrb[14].mxu1  ;;  %v1220_v15 = vsel %vm1207_vm3, %v1203_v12, -inf }
 0x4f3   : > { %v1204_v17 = vsel %vm1194_vm4, %v1137_v14, -1e+30  ;;  %1221 = vmax.xlane.f32.xlu1 %v1220_v15  ;;  %v2827_v18 = vpop.f32.mrb[15].mxu1 }
 0x4f4   : > { %v1223_v19 = vsel %vm1207_vm3, %v1204_v17, -inf }
 0x4f5   : > { %1224 = vmax.xlane.f32.xlu0 %v1223_v19 }
 0x4f8   : > { %v1181_v20 = vpop.f32.mrb[16].mxu1 }
 0x4f9   : > { %v1205_v21 = vsel %vm1193_vm2, %v1181_v20, -1e+30  ;;  %v2832_v22 = vpop.f32.mrb[17].mxu1 }
 0x4fa   : > { %v1184_v23 = vpop.f32.mrb[18].mxu1  ;;  %v1226_v24 = vsel %vm1207_vm3, %v1205_v21, -inf }
 0x4fb   : > { %v1206_v25 = vsel %vm1194_vm4, %v1184_v23, -1e+30  ;;  %1227 = vmax.xlane.f32.xlu1 %v1226_v24  ;;  %v2833_v26 = vpop.f32.mrb[19].mxu1 }
 0x4fc   : > { %v1229_v27 = vsel %vm1207_vm3, %v1206_v25, -inf }
 0x4fd   : > { %1230 = vmax.xlane.f32.xlu0 %v1229_v27 }
 0x501   : > { %v1210_v34 = vpop.xlane.xlu1 %1209 }
 0x502   : > { %v1232_v35 = vsub.f32 %v1199_v60, %v1210_v34 }
 0x503   : > { %v1213_v28 = vpop.xlane.xlu0 %1212 }
 0x504   : > { %v1233_v29 = vsub.f32 %v1200_v0, %v1213_v28  ;;  %v1240_v36 = vmul.f32 1.442695, %v1232_v35 }
 0x506   : > { %v1242_v31 = vmul.f32 1.442695, %v1233_v29 }
 0x508   : > { %3230 = vpow2.f32 %v1242_v31 }
 0x509   : > { %3232 = vpow2.f32 %v1240_v36 }
 0x50c   : > { %3077 = vrot.lane.b32.xlu1 %v4290_v16, %s3766_s1 }
 0x512   : > { %v4346_v32 = vpop.eup %3230 }
 0x513   : > { %v1259_v33 = vsel %vm1207_vm3, %v4346_v32, 0.0  ;;  %v3233_v37 = vpop.eup %3232 }
 0x514   : > { %1260 = vadd.xlane.f32.xlu0 %v1259_v33  ;;  %v1256_v38 = vsel %vm1207_vm3, %v3233_v37, 0.0 }
 0x530   : > { %1257 = vadd.xlane.f32.xlu1 %v1256_v38 }
 0x578   : > { %v1216_v39 = vpop.xlane.xlu0 %1215 }
 0x579   : > { %v1234_v40 = vsub.f32 %v1201_v3, %v1216_v39 }
 0x57b   : > { %v1244_v41 = vmul.f32 1.442695, %v1234_v40 }
 0x57c   : > { %v1219_v42 = vpop.xlane.xlu0 %1218 }
 0x57d   : > { %3234 = vpow2.f32 %v1244_v41  ;;  %v1235_v43 = vsub.f32 %v1202_v8, %v1219_v42 }
 0x57f   : > { %v1246_v44 = vmul.f32 1.442695, %v1235_v43 }
 0x580   : > { %v1222_v45 = vpop.xlane.xlu1 %1221 }
 0x581   : > { %3236 = vpow2.f32 %v1246_v44  ;;  %v1236_v46 = vsub.f32 %v1203_v12, %v1222_v45 }
 0x582   : > { %v1225_v47 = vpop.xlane.xlu0 %1224 }
 0x583   : > { %v1248_v48 = vmul.f32 1.442695, %v1236_v46  ;;  %v1237_v49 = vsub.f32 %v1204_v17, %v1225_v47 }
 0x585   : > { %3238 = vpow2.f32 %v1248_v48  ;;  %v1250_v50 = vmul.f32 1.442695, %v1237_v49 }
 0x587   : > { %v3235_v51 = vpop.eup %3234  ;;  %3240 = vpow2.f32 %v1250_v50 }
 0x588   : > { %v1228_v52 = vpop.xlane.xlu1 %1227  ;;  %v1262_v56 = vsel %vm1207_vm3, %v3235_v51, 0.0 }
 0x589   : > { %v1238_v59 = vsub.f32 %v1205_v21, %v1228_v52  ;;  %1263 = vadd.xlane.f32.xlu1 %v1262_v56  ;;  %v3139_v52 = vld [vmem:[#allocation11 + $0x8] sm:$0xff]   ;;  %v3140_v56 = vld [vmem:[#allocation11 + $0x10] sm:$0xff]  }
 0x58a   : > { %v1231_v60 = vpop.xlane.xlu0 %1230 }
 0x58b   : > { %v3237_v61 = vpop.eup %3236  ;;  %v1252_v62 = vmul.f32 1.442695, %v1238_v59  ;;  %v1239_v63 = vsub.f32 %v1206_v25, %v1231_v60 }
 0x58c   : > { %v3078_v0 = vpop.permute.xlu1 %3077  ;;  %v1265_v1 = vsel %vm1207_vm3, %v3237_v61, 0.0 }
 0x58d   : > { %3242 = vpow2.f32 %v1252_v62  ;;  %v1254_v53 = vmul.f32 1.442695, %v1239_v63  ;;  %v3080_v2 = vunpack.i.h.bf16 %v3078_v0  ;;  %v3079_v3 = vunpack.i.l.bf16 %v3078_v0  ;;  %1266 = vadd.xlane.f32.xlu0 %v1265_v1  ;;  %v3141_v63 = vld [vmem:[#allocation11 + $0x18] sm:$0xff]   ;;  %v3142_v0 = vld [vmem:[#allocation11 + $0x20] sm:$0xff]   ;;  %v3143_v1 = vld [vmem:[#allocation11 + $0x28] sm:$0xff]  }
 0x58f   : > { %v3239_v5 = vpop.eup %3238  ;;  %3244 = vpow2.f32 %v1254_v53  ;;  %v1301_v6 = vpack.c.bf16 %v3080_v2, %v3079_v3 }
 0x590   : > { %v1268_v7 = vsel %vm1207_vm3, %v3239_v5, 0.0 }
 0x591   : > { %v3241_v8 = vpop.eup %3240  ;;  %1269 = vadd.xlane.f32.xlu1 %v1268_v7  ;;  %2841 = vmatpush3.bf16.msra.mxu1 %v1301_v6  ;;  %v3144_v7 = vld [vmem:[#allocation11 + $0x30] sm:$0xff]  }
 0x592   : > { %v1271_v9 = vsel %vm1207_vm3, %v3241_v8, 0.0  ;;  %2852 = vmatprep.subr.bf16.mxu1 %v3763_v4 }
 0x593   : > { %1272 = vadd.xlane.f32.xlu0 %v1271_v9 }
 0x597   : > { %v3243_v10 = vpop.eup %3242 }
 0x598   : > { %v1274_v11 = vsel %vm1207_vm3, %v3243_v10, 0.0 }
 0x599   : > { %v3245_v12 = vpop.eup %3244  ;;  %1275 = vadd.xlane.f32.xlu1 %v1274_v11 }
 0x59a   : > { %v1277_v13 = vsel %vm1207_vm3, %v3245_v12, 0.0 }
 0x59b   : > { %1278 = vadd.xlane.f32.xlu0 %v1277_v13 }
 0x5a1   : > { %v1261_v14 = vpop.xlane.xlu0 %1260 }
 0x5a2   : > { %3246 = vrcp.f32 %v1261_v14 }
 0x5aa   : > { %3087 = vrot.lane.b32.xlu1 %v4290_v16, %s3768_s30 }
 0x5ac   : > { %v3247_v17 = vpop.eup %3246 }
 0x5ad   : > { %v1289_v19 = vmul.f32 %v3247_v17, %v4346_v32 }
 0x5b1   : > { %3082 = vrot.lane.b32.xlu0 %v4290_v16, %s3767_s3 }
 0x5bd   : > { %v1258_v15 = vpop.xlane.xlu1 %1257 }
 0x5be   : > { %3248 = vrcp.f32 %v1258_v15 }
 0x5c8   : > { %v3249_v18 = vpop.eup %3248 }
 0x5c9   : > { %v1288_v20 = vmul.f32 %v3249_v18, %v3233_v37 }
 0x5cb   : > { %v1296_v21 = vpack.c.bf16 %v1289_v19, %v1288_v20 }
 0x5cd   : > { %2837 = vmatmul.mubr.msk.bf16.vlgmr.msra.gmra.mrb[4].mxu0 %vm1207_vm3, %v1296_v21 }
 0x5ce   : > { %2848 = vmatprep.mubr.msk.bf16.mxu0 %vm3765_vm0, %v3763_v4 }
 0x616   : > { %v1264_v22 = vpop.xlane.xlu1 %1263 }
 0x617   : > { %3250 = vrcp.f32 %v1264_v22 }
 0x61a   : > { %v1267_v23 = vpop.xlane.xlu0 %1266 }
 0x61b   : > { %3252 = vrcp.f32 %v1267_v23 }
 0x61e   : > { %v1270_v16 = vpop.xlane.xlu1 %1269 }
 0x620   : > { %v1273_v24 = vpop.xlane.xlu0 %1272 }
 0x621   : > { %3254 = vrcp.f32 %v1273_v24  ;;  %v3251_v25 = vpop.eup %3250 }
 0x622   : > { %3256 = vrcp.f32 %v1270_v16  ;;  %v1290_v27 = vmul.f32 %v3251_v25, %v3235_v51  ;;  %v3138_v51 = vld [vmem:[#allocation11] sm:$0xff]  }
 0x625   : > { %v3253_v26 = vpop.eup %3252 }
 0x626   : > { %v1291_v28 = vmul.f32 %v3253_v26, %v3237_v61  ;;  %v1276_v29 = vpop.xlane.xlu1 %1275 }
 0x627   : > { %3258 = vrcp.f32 %v1276_v29 }
 0x628   : > { %v1279_v31 = vpop.xlane.xlu0 %1278  ;;  %v1297_v32 = vpack.c.bf16 %v1291_v28, %v1290_v27 }
 0x629   : > { %3260 = vrcp.f32 %v1279_v31 }
 0x62a   : > { %v3088_v33 = vpop.permute.xlu1 %3087  ;;  %2843 = vmatmul.mubr.msk.bf16.vlgmr.msra.gmra.mrb[20].mxu1 %vm1207_vm3, %v1297_v32 }
 0x62b   : > { %v3255_v34 = vpop.eup %3254  ;;  %v3090_v35 = vunpack.i.h.bf16 %v3088_v33  ;;  %v3089_v36 = vunpack.i.l.bf16 %v3088_v33  ;;  %2854 = vmatprep.mubr.msk.bf16.mxu1 %vm3765_vm0, %v3763_v4 }
 0x62c   : > { %v3083_v37 = vpop.permute.xlu0 %3082  ;;  %v3257_v38 = vpop.eup %3256  ;;  %v1293_v42 = vmul.f32 %v3255_v34, %v3241_v8  ;;  %v3145_v8 = vld [vmem:[#allocation11 + $0x38] sm:$0xff]  }
 0x62d   : > { %v1303_v39 = vpack.c.bf16 %v3090_v35, %v3089_v36  ;;  %v3085_v40 = vunpack.i.h.bf16 %v3083_v37  ;;  %v3084_v41 = vunpack.i.l.bf16 %v3083_v37  ;;  %v1292_v44 = vmul.f32 %v3257_v38, %v3239_v5  ;;  %v2629_v35 = vld [vmem:[#allocation13] ss:$0 sm:$0xff] }
 0x62f   : > { %v1302_v43 = vpack.c.bf16 %v3085_v40, %v3084_v41  ;;  %2853 = vmatpush3.bf16.msra.mxu1 %v1303_v39  ;;  %v1298_v46 = vpack.c.bf16 %v1293_v42, %v1292_v44  ;;  %v3282_v40 = vld [vmem:[%s4218_s25] sm:$0xff]  ;;  %v3283_v44 = vld [vmem:[%s4218_s25 + $0x8] sm:$0xff]  ;;  %s4424_s25 = scalar_lea.hbm %s4532_s16, %s2711_s14 }
 0x631   : > { %v3259_v45 = vpop.eup %3258  ;;  %2847 = vmatpush3.bf16.msra.mxu0 %v1302_v43 }
 0x632   : > { %2858 = vmatprep.subr.bf16.mxu0 %v3763_v4  ;;  %v1294_v48 = vmul.f32 %v3259_v45, %v3243_v10 }
 0x633   : > { %v3261_v47 = vpop.eup %3260 }
 0x634   : > { %v1295_v49 = vmul.f32 %v3261_v47, %v3245_v12  ;;  %2849 = vmatmul.mubr.msk.bf16.vlgmr.msra.gmra.mrb[8].mxu0 %vm1207_vm3, %v1298_v46  ;;  %v3146_v46 = vld [vmem:[#allocation17] ss:$16 sps:$4 sm:$0xff]   ;;  %v3148_v47 = vld [vmem:[#allocation17 + $0x4] ss:$16 sps:$4 sm:$0xff]  }
 0x635   : > { %2874 = vmatprep.mubr.msk.bf16.mxu0 %vm3765_vm0, %v3763_v4  ;;  %2859 = vmatpush3.bf16.msra.mxu0 %v3138_v51  ;;  %v3152_v51 = vld [vmem:[#allocation17 + $0x20] ss:$16 sps:$4 sm:$0xff]  }
 0x636   : > { %v1299_v50 = vpack.c.bf16 %v1295_v49, %v1294_v48  ;;  %2860 = vmatprep.subr.bf16.mxu0 %v3763_v4  ;;  %v3151_v48 = vld [vmem:[#allocation17 + $0xc] ss:$16 sps:$4 sm:$0xff]   ;;  %v3154_v49 = vld [vmem:[#allocation17 + $0x24] ss:$16 sps:$4 sm:$0xff]   ;;  %1882 = vmatprep.subr.bf16.mxu1 %v3148_v47 }
 0x637   : > { %v3197_v47 = vld [vmem:[#allocation20 + $0x80] sm:$0xff]  }
 0x638   : > { %2855 = vmatmul.mubr.msk.bf16.vlgmr.msra.gmra.mrb[24].mxu1 %vm1207_vm3, %v1299_v50  ;;  %v3157_v50 = vld [vmem:[#allocation17 + $0x2c] ss:$16 sps:$4 sm:$0xff]  }
 0x639   : > { %1914 = vmatprep.mubr.bf16.mxu1 %v3764_v30  ;;  %2861 = vmatpush3.bf16.msra.mxu0 %v3139_v52  ;;  %v3155_v52 = vld [vmem:[#allocation17 + $0x28] ss:$16 sps:$4 sm:$0xff]  }
 0x63a   : > { %2862 = vmatprep.subr.bf16.mxu0 %v3763_v4  ;;  %1883 = vmatpush1.bf16.msra.mxu1 %v3146_v46  ;;  %v3196_v46 = vld [vmem:[#allocation20] sm:$0xff]  }
 0x63b   : > { %1884 = vmatprep.subr.bf16.mxu1 %v3154_v49  ;;  %v3199_v49 = vld [vmem:[#allocation20 + $0xc8] sm:$0xff]  }
 0x63d   : > { %2863 = vmatpush3.bf16.msra.mxu0 %v3140_v56 }
 0x63e   : > { %2864 = vmatprep.subr.bf16.mxu0 %v3763_v4  ;;  %1885 = vmatpush1.bf16.msra.mxu1 %v3152_v51  ;;  %v3201_v51 = vld [vmem:[#allocation20 + $0x88] sm:$0xff]  }
 0x641   : > { %2865 = vmatpush3.bf16.msra.mxu0 %v3141_v63 }
 0x642   : > { %2866 = vmatprep.subr.bf16.mxu0 %v3763_v4 }
 0x645   : > { %2867 = vmatpush3.bf16.msra.mxu0 %v3142_v0 }
 0x646   : > { %2868 = vmatprep.subr.bf16.mxu0 %v3763_v4 }
 0x649   : > { %2869 = vmatpush3.bf16.msra.mxu0 %v3143_v1 }
 0x64a   : > { %2870 = vmatprep.subr.bf16.mxu0 %v3763_v4 }
 0x64d   : > { %2871 = vmatpush3.bf16.msra.mxu0 %v3144_v7  ;;  %v3169_v7 = vld [vmem:[#allocation17 + $0x6c] ss:$16 sps:$4 sm:$0xff]  }
 0x64e   : > { %2872 = vmatprep.subr.bf16.mxu0 %v3763_v4 }
 0x651   : > { %2873 = vmatpush3.bf16.msra.mxu0 %v3145_v8  ;;  %v3164_v8 = vld [vmem:[#allocation17 + $0x60] ss:$16 sps:$4 sm:$0xff]  }
 0x652   : > { %1925 = vmatprep.subr.bf16.mxu0 %v3151_v48  ;;  %v3198_v48 = vld [vmem:[#allocation20 + $0x48] sm:$0xff]  }
 0x6a0   : > { %v1341_v59 = vpop.f32.mrb[4].mxu0 }
 0x6a1   : > { %v2838_v60 = vpop.f32.mrb[5].mxu0 }
 0x6a2   : > { %v1344_v61 = vpop.f32.mrb[6].mxu0 }
 0x6a3   : > { %v2839_v62 = vpop.f32.mrb[7].mxu0 }
 0x6fd   : > { %v1385_v53 = vpop.f32.mrb[20].mxu1 }
 0x6fe   : > { %v2844_v2 = vpop.f32.mrb[21].mxu1 }
 0x6ff   : > { %v1388_v3 = vpop.f32.mrb[22].mxu1  ;;  %v3163_v2 = vld [vmem:[#allocation17 + $0x4c] ss:$16 sps:$4 sm:$0xff]  }
 0x700   : > { %v3091_v5 = vpack.i.bf16 %v1388_v3, %v1385_v53  ;;  %v2845_v6 = vpop.f32.mrb[23].mxu1  ;;  %v3160_v53 = vld [vmem:[#allocation17 + $0x44] ss:$16 sps:$4 sm:$0xff]   ;;  %v3158_v3 = vld [vmem:[#allocation17 + $0x40] ss:$16 sps:$4 sm:$0xff]  }
 0x701   : > { %1886 = vmatprep.subr.bf16.mxu1 %v3160_v53  ;;  %v3166_v6 = vld [vmem:[#allocation17 + $0x64] ss:$16 sps:$4 sm:$0xff]  }
 0x702   : > { %3092 = vrot.lane.b32.xlu1 %v3091_v5, %s3768_s30  ;;  %v3161_v5 = vld [vmem:[#allocation17 + $0x48] ss:$16 sps:$4 sm:$0xff]   ;;  %1887 = vmatpush1.bf16.msra.mxu1 %v3158_v3 }
 0x703   : > { %1888 = vmatprep.subr.bf16.mxu1 %v3166_v6  ;;  %v3211_v53 = vld [vmem:[#allocation20 + $0xe0] sm:$0xff]   ;;  %v3215_v6 = vld [vmem:[#allocation20 + $0xe8] sm:$0xff]  }
 0x704   : > { %v3213_v3 = vld [vmem:[#allocation20 + $0xa0] sm:$0xff]  }
 0x706   : > { %1889 = vmatpush1.bf16.msra.mxu1 %v3164_v8  ;;  %v3217_v8 = vld [vmem:[#allocation20 + $0xa8] sm:$0xff]  }
 0x707   : > { %v1429_v9 = vpop.f32.mrb[8].mxu0 }
 0x708   : > { %v2850_v10 = vpop.f32.mrb[9].mxu0 }
 0x709   : > { %v1432_v11 = vpop.f32.mrb[10].mxu0  ;;  %v3172_v10 = vld [vmem:[#allocation17 + $0x84] ss:$16 sps:$4 sm:$0xff]  }
 0x70a   : > { %v3096_v12 = vpack.i.bf16 %v1432_v11, %v1429_v9  ;;  %v2851_v13 = vpop.f32.mrb[11].mxu0  ;;  %v3167_v9 = vld [vmem:[#allocation17 + $0x68] ss:$16 sps:$4 sm:$0xff]   ;;  %v3175_v11 = vld [vmem:[#allocation17 + $0x8c] ss:$16 sps:$4 sm:$0xff]   ;;  %1890 = vmatprep.subr.bf16.mxu1 %v3172_v10 }
 0x70b   : > { %v1473_v14 = vpop.f32.mrb[24].mxu1  ;;  %v3173_v13 = vld [vmem:[#allocation17 + $0x88] ss:$16 sps:$4 sm:$0xff]  }
 0x70c   : > { %3097 = vrot.lane.b32.xlu1 %v3096_v12, %s3767_s3  ;;  %v2856_v15 = vpop.f32.mrb[25].mxu1  ;;  %v3170_v12 = vld [vmem:[#allocation17 + $0x80] ss:$16 sps:$4 sm:$0xff]   ;;  %v3219_v10 = vld [vmem:[#allocation20 + $0xf0] sm:$0xff]   ;;  %s3654_s3 = sshll.u32 %s3769_s15, 4  ;;  %s3655_s3 = int_to_ptr.vmem [resolvable:$false] %s3654_s3 }
 0x70d   : > { %v1476_v17 = vpop.f32.mrb[26].mxu1  ;;  %1891 = vmatpush1.bf16.msra.mxu1 %v3170_v12  ;;  %v3181_v15 = vld [vmem:[#allocation17 + $0xac] ss:$16 sps:$4 sm:$0xff]   ;;  %v3221_v12 = vld [vmem:[#allocation20 + $0xb0] sm:$0xff]   ;;  %s3656_s30 = scalar_lea.vmem %s3655_s3, 512  ;;  %p3657_p12 = scmp.lt.s32.totalorder %s4419_s19, %s3655_s3 }
 0x70e   : > { %v3101_v18 = vpack.i.bf16 %v1476_v17, %v1473_v14  ;;  %v2857_v19 = vpop.f32.mrb[27].mxu1  ;;  %v3178_v14 = vld [vmem:[#allocation17 + $0xa4] ss:$16 sps:$4 sm:$0xff]   ;;  %v3176_v17 = vld [vmem:[#allocation17 + $0xa0] ss:$16 sps:$4 sm:$0xff]  }
 0x70f   : > { %1892 = vmatprep.subr.bf16.mxu1 %v3178_v14  ;;  %v3182_v19 = vld [vmem:[#allocation17 + $0xc0] ss:$16 sps:$4 sm:$0xff]  }
 0x710   : > { %3102 = vrot.lane.b32.xlu0 %v3101_v18, %s3766_s1  ;;  %v3179_v18 = vld [vmem:[#allocation17 + $0xa8] ss:$16 sps:$4 sm:$0xff]   ;;  %v3223_v14 = vld [vmem:[#allocation20 + $0xf8] sm:$0xff]   ;;  %s3650_s1 = scalar_lea.vmem %s4419_s19, 256 }
 0x711   : > { %1893 = vmatpush1.bf16.msra.mxu1 %v3176_v17  ;;  %v3225_v17 = vld [vmem:[#allocation20 + $0xb8] sm:$0xff]   ;;  %p3651_p2 = scmp.ne.s32.totalorder %s4419_s19, %s3650_s1  ;;  %p3658_p0 = scmp.lt.s32.totalorder %s3656_s30, %s3650_s1 }
 0x713   : > { %p3652_p10 = pnand %p3651_p2, %p4533_p8  ;;  %p3659_p5 = por %p3658_p0, %p3657_p12 }
 0x715   : > { %p3653_p11 = pneg %p3652_p10 }
 0x717   : > { %p3660_p7 = pnand %p3659_p5, %p3653_p11 }
 0x774   : > { %v3093_v20 = vpop.permute.xlu1 %3092 }
 0x775   : > { %v3095_v22 = vunpack.i.h.bf16 %v3093_v20  ;;  %v3094_v4 = vunpack.i.l.bf16 %v3093_v20  ;;  %v3184_v20 = vld [vmem:[#allocation17 + $0xc4] ss:$16 sps:$4 sm:$0xff]  }
 0x776   : > { %1894 = vmatprep.subr.bf16.mxu1 %v3184_v20 }
 0x777   : > { %v1505_v25 = vsel %vm999_vm1, %v1344_v61, %v3095_v22  ;;  %v1504_v26 = vsel %vm999_vm1, %v1341_v59, %v3094_v4  ;;  %v3187_v22 = vld [vmem:[#allocation17 + $0xcc] ss:$16 sps:$4 sm:$0xff]   ;;  %v3190_v4 = vld [vmem:[#allocation17 + $0xe4] ss:$16 sps:$4 sm:$0xff]   ;;  %1895 = vmatpush1.bf16.msra.mxu1 %v3182_v19  ;;  %v1716_v19 = vsub.s32 3, %v4278_v54 }
 0x778   : > { %1896 = vmatprep.subr.bf16.mxu1 %v3190_v4 }
 0x77e   : > { %v3098_v21 = vpop.permute.xlu1 %3097 }
 0x77f   : > { %v3100_v23 = vunpack.i.h.bf16 %v3098_v21  ;;  %v3099_v16 = vunpack.i.l.bf16 %v3098_v21  ;;  %v3185_v21 = vld [vmem:[#allocation17 + $0xc8] ss:$16 sps:$4 sm:$0xff]  }
 0x781   : > { %v1507_v29 = vsel %vm1506_vm5, %v1504_v26, %v3099_v16  ;;  %v1508_v31 = vsel %vm1506_vm5, %v1505_v25, %v3100_v23  ;;  %v3193_v23 = vld [vmem:[#allocation17 + $0xec] ss:$16 sps:$4 sm:$0xff]   ;;  %v3188_v16 = vld [vmem:[#allocation17 + $0xe0] ss:$16 sps:$4 sm:$0xff]   ;;  %v3194_v25 = vld [vmem:[#allocation20 + $0x40] sm:$0xff]  }
 0x782   : > { %v3103_v24 = vpop.permute.xlu0 %3102  ;;  %1897 = vmatpush1.bf16.msra.mxu1 %v3188_v16  ;;  %v3195_v26 = vld [vmem:[#allocation20 + $0xc0] sm:$0xff]  }
 0x783   : > { %v3105_v27 = vunpack.i.h.bf16 %v3103_v24  ;;  %v3104_v28 = vunpack.i.l.bf16 %v3103_v24  ;;  %v3191_v24 = vld [vmem:[#allocation17 + $0xe8] ss:$16 sps:$4 sm:$0xff]   ;;  %2746 = vmatprep.subr.bf16.mxu1 %v3194_v25 }
 0x785   : > { %v1511_v32 = vsel %vm1509_vm6, %v1508_v31, %v3105_v27  ;;  %v1510_v33 = vsel %vm1509_vm6, %v1507_v29, %v3104_v28 }
 0x786   : > { %v1512_v34 = vpack.c.bf16 %v1511_v32, %v1510_v33 }
 0x788   : > { %2875 = vmatmul.mubr.bf16.vlgmr.msra.gmra.mrb[12].mxu0 %v1512_v34 }
 0x789   : > { %1957 = vmatprep.mubr.bf16.mxu0 %v3764_v30  ;;  %v3149_v30 = vld [vmem:[#allocation17 + $0x8] ss:$16 sps:$4 sm:$0xff]  }
 0x78a   : > { %1926 = vmatpush1.bf16.msra.mxu0 %v3149_v30 }
 0x78b   : > { %1927 = vmatprep.subr.bf16.mxu0 %v3157_v50  ;;  %v3200_v50 = vld [vmem:[#allocation20 + $0x8] sm:$0xff]  }
 0x78e   : > { %1928 = vmatpush1.bf16.msra.mxu0 %v3155_v52  ;;  %v3202_v52 = vld [vmem:[#allocation20 + $0x50] sm:$0xff]  }
 0x78f   : > { %1929 = vmatprep.subr.bf16.mxu0 %v3163_v2  ;;  %v3212_v2 = vld [vmem:[#allocation20 + $0x20] sm:$0xff]  }
 0x792   : > { %1930 = vmatpush1.bf16.msra.mxu0 %v3161_v5  ;;  %v3214_v5 = vld [vmem:[#allocation20 + $0x68] sm:$0xff]  }
 0x793   : > { %1931 = vmatprep.subr.bf16.mxu0 %v3169_v7  ;;  %v3216_v7 = vld [vmem:[#allocation20 + $0x28] sm:$0xff]  }
 0x796   : > { %1932 = vmatpush1.bf16.msra.mxu0 %v3167_v9  ;;  %v3218_v9 = vld [vmem:[#allocation20 + $0x70] sm:$0xff]  }
 0x797   : > { %1933 = vmatprep.subr.bf16.mxu0 %v3175_v11  ;;  %v3220_v11 = vld [vmem:[#allocation20 + $0x30] sm:$0xff]  }
 0x79a   : > { %1934 = vmatpush1.bf16.msra.mxu0 %v3173_v13  ;;  %v3222_v13 = vld [vmem:[#allocation20 + $0x78] sm:$0xff]  }
 0x79b   : > { %1935 = vmatprep.subr.bf16.mxu0 %v3181_v15  ;;  %v3224_v15 = vld [vmem:[#allocation20 + $0x38] sm:$0xff]  }
 0x79e   : > { %1936 = vmatpush1.bf16.msra.mxu0 %v3179_v18  ;;  %v1700_v18 = vld [vmem:[#allocation19] sm:$0xf] }
 0x79f   : > { %1937 = vmatprep.subr.bf16.mxu0 %v3187_v22  ;;  %v1705_v20 = vrot.slane %v1700_v18, %v698_v55  ;;  %v1709_v22 = vrot.slane %v1700_v18, %v702_v58  ;;  %v1717_v4 = vrot.slane %v1700_v18, %v1716_v19 }
 0x7a2   : > { %1938 = vmatpush1.bf16.msra.mxu0 %v3185_v21  ;;  %v1713_v21 = vrot.slane %v1700_v18, %v706_v57 }
 0x7a3   : > { %1939 = vmatprep.subr.bf16.mxu0 %v3193_v23 }
 0x7a6   : > { %1940 = vmatpush1.bf16.msra.mxu0 %v3191_v24 }
 0x7a7   : > { %2768 = vmatprep.subr.bf16.mxu0 %v3195_v26 }
 0x85b   : > { %v1618_v36 = vpop.f32.mrb[12].mxu0 }
 0x85c   : > { %v1619_v37 = vadd.f32 %v2629_v35, %v1618_v36  ;;  %v2876_v38 = vpop.f32.mrb[13].mxu0  ;;  %v2638_v36 = vld [vmem:[#allocation14] ss:$0 sm:$0xff] }
 0x85d   : > { %v1621_v39 = vpop.f32.mrb[14].mxu0 }
 0x85e   : > { %v4389_v41 = vadd.f32 %v3282_v40, %v1619_v37  ;;  %v1622_v42 = vadd.f32 %v2629_v35, %v1621_v39  ;;  %v2877_v43 = vpop.f32.mrb[15].mxu0  ;;  %v2639_v40 = vld [vmem:[#allocation16] ss:$0 sm:$0xff] }
 0x860   : > { %v4392_v45 = vadd.f32 %v3283_v44, %v1622_v42  ;;  %1629 = vadd.xlane.f32.xlu1 %v4389_v41 }
 0x862   : > { %1631 = vadd.xlane.f32.xlu0 %v4392_v45 }
 0x8ed   : > { %v1630_v56 = vpop.xlane.xlu1 %1629 }
 0x8ee   : > { %v1633_v59 = vmul.f32 0.0078125, %v1630_v56  ;;  %v3203_v56 = vld [vmem:[#allocation20 + $0xd0] sm:$0xff]  }
 0x8ef   : > { %v1632_v60 = vpop.xlane.xlu0 %1631 }
 0x8f0   : > { %v4397_v61 = vsub.f32 %v4389_v41, %v1633_v59  ;;  %v1634_v62 = vmul.f32 0.0078125, %v1632_v60  ;;  %v3204_v59 = vld [vmem:[#allocation20 + $0x10] sm:$0xff]  }
 0x8f1   : > { %v3205_v60 = vld [vmem:[#allocation20 + $0x90] sm:$0xff]  }
 0x8f2   : > { %v4400_v63 = vsub.f32 %v4392_v45, %v1634_v62  ;;  %v1637_v0 = vmul.f32 %v4397_v61, %v4397_v61  ;;  %v3207_v62 = vld [vmem:[#allocation20 + $0xd8] sm:$0xff]  }
 0x8f4   : > { %1639 = vadd.xlane.f32.xlu0 %v1637_v0  ;;  %v1638_v1 = vmul.f32 %v4400_v63, %v4400_v63  ;;  %v3209_v0 = vld [vmem:[#allocation20 + $0x98] sm:$0xff]  }
 0x8f8   : > { %1641 = vadd.xlane.f32.xlu0 %v1638_v1  ;;  %v3210_v1 = vld [vmem:[#allocation20 + $0x60] sm:$0xff]  }
 0x981   : > { %v1640_v27 = vpop.xlane.xlu0 %1639 }
 0x982   : > { %v1643_v28 = vmul.f32 0.0078125, %v1640_v27 }
 0x984   : > { %v1645_v29 = vadd.f32 1e-05, %v1643_v28 }
 0x985   : > { %v1642_v31 = vpop.xlane.xlu0 %1641 }
 0x986   : > { %3262 = vrsqrt.f32 %v1645_v29  ;;  %v1644_v32 = vmul.f32 0.0078125, %v1642_v31 }
 0x988   : > { %v1646_v33 = vadd.f32 1e-05, %v1644_v32 }
 0x98a   : > { %3264 = vrsqrt.f32 %v1646_v33 }
 0x990   : > { %v3263_v34 = vpop.eup %3262 }
 0x991   : > { %v1649_v35 = vmul.f32 %v3263_v34, %v4397_v61  ;;  %v3206_v61 = vld [vmem:[#allocation20 + $0x58] sm:$0xff]  }
 0x993   : > { %v1657_v39 = vmul.f32 %v2638_v36, %v1649_v35 }
 0x994   : > { %v3265_v37 = vpop.eup %3264 }
 0x995   : > { %v1650_v38 = vmul.f32 %v3265_v37, %v4400_v63  ;;  %v1665_v43 = vadd.f32 %v2639_v40, %v1657_v39  ;;  %v3208_v63 = vld [vmem:[#allocation20 + $0x18] sm:$0xff]  }
 0x997   : > { %v1658_v42 = vmul.f32 %v2638_v36, %v1650_v38 }
 0x999   : > { %v1666_v44 = vadd.f32 %v2639_v40, %v1658_v42 }
 0x99b   : > { %v1667_v30 = vpack.c.bf16 %v1666_v44, %v1665_v43 }
 0x99d   : > { %1915 = vmatmul.mubr.bf16.vlgmr.msra.gmra.mrb[28].mxu1 %v1667_v30  ;;  %1958 = vmatmul.mubr.bf16.vlgmr.msra.gmra.mrb[16].mxu0 %v1667_v30 }
 0x99e   : > { %2747 = vmatpush3.bf16.msra.mxu1 %v3196_v46  ;;  %2769 = vmatpush3.bf16.msra.mxu0 %v3197_v47 }
 0x99f   : > { %2748 = vmatprep.subr.bf16.mxu1 %v3198_v48  ;;  %2770 = vmatprep.subr.bf16.mxu0 %v3199_v49 }
 0x9a2   : > { %2749 = vmatpush3.bf16.msra.mxu1 %v3200_v50  ;;  %2771 = vmatpush3.bf16.msra.mxu0 %v3201_v51 }
 0x9a3   : > { %2750 = vmatprep.subr.bf16.mxu1 %v3202_v52  ;;  %2772 = vmatprep.subr.bf16.mxu0 %v3203_v56 }
 0x9a6   : > { %2751 = vmatpush3.bf16.msra.mxu1 %v3204_v59  ;;  %2773 = vmatpush3.bf16.msra.mxu0 %v3205_v60 }
 0x9a7   : > { %2752 = vmatprep.subr.bf16.mxu1 %v3206_v61  ;;  %2774 = vmatprep.subr.bf16.mxu0 %v3207_v62 }
 0x9aa   : > { %2753 = vmatpush3.bf16.msra.mxu1 %v3208_v63  ;;  %2775 = vmatpush3.bf16.msra.mxu0 %v3209_v0 }
 0x9ab   : > { %2754 = vmatprep.subr.bf16.mxu1 %v3210_v1  ;;  %2776 = vmatprep.subr.bf16.mxu0 %v3211_v53 }
 0x9ae   : > { %2755 = vmatpush3.bf16.msra.mxu1 %v3212_v2  ;;  %2777 = vmatpush3.bf16.msra.mxu0 %v3213_v3 }
 0x9af   : > { %2756 = vmatprep.subr.bf16.mxu1 %v3214_v5  ;;  %2778 = vmatprep.subr.bf16.mxu0 %v3215_v6 }
 0x9b2   : > { %2757 = vmatpush3.bf16.msra.mxu1 %v3216_v7  ;;  %2779 = vmatpush3.bf16.msra.mxu0 %v3217_v8 }
 0x9b3   : > { %2758 = vmatprep.subr.bf16.mxu1 %v3218_v9  ;;  %2780 = vmatprep.subr.bf16.mxu0 %v3219_v10 }
 0x9b6   : > { %2759 = vmatpush3.bf16.msra.mxu1 %v3220_v11  ;;  %2781 = vmatpush3.bf16.msra.mxu0 %v3221_v12 }
 0x9b7   : > { %2760 = vmatprep.subr.bf16.mxu1 %v3222_v13  ;;  %2782 = vmatprep.subr.bf16.mxu0 %v3223_v14 }
 0x9ba   : > { %2761 = vmatpush3.bf16.msra.mxu1 %v3224_v15  ;;  %2783 = vmatpush3.bf16.msra.mxu0 %v3225_v17 }
 0xa70   : > { %v1916_v23 = vpop.f32.mrb[28].mxu1  ;;  %v1959_v16 = vpop.f32.mrb[16].mxu0 }
 0xa71   : > { %v1917_v24 = vadd.f32 %v1916_v23, %v1705_v20  ;;  %v1960_v25 = vadd.f32 %v1959_v16, %v1713_v21  ;;  %v1918_v26 = vpop.f32.mrb[29].mxu1  ;;  %v1961_v27 = vpop.f32.mrb[17].mxu0  ;;  %v2672_v23 = vld [vmem:[#allocation22] ss:$0 sm:$0xff] }
 0xa72   : > { %v1919_v28 = vadd.f32 %v1918_v26, %v1709_v22  ;;  %v1962_v29 = vadd.f32 %v1961_v27, %v1717_v4  ;;  %v1920_v31 = vpop.f32.mrb[30].mxu1  ;;  %v1963_v32 = vpop.f32.mrb[18].mxu0 }
 0xa73   : > { %v1976_v33 = vmul.f32 0.70710677, %v1917_v24  ;;  %v1978_v34 = vmul.f32 0.70710677, %v1960_v25  ;;  %v1921_v57 = vadd.f32 %v1920_v31, %v1705_v20  ;;  %v1964_v36 = vadd.f32 %v1963_v32, %v1713_v21  ;;  %v1922_v54 = vpop.f32.mrb[31].mxu1  ;;  %v1965_v58 = vpop.f32.mrb[19].mxu0 }
 0xa74   : > { %v1977_v55 = vmul.f32 0.70710677, %v1919_v28  ;;  %v1979_v35 = vmul.f32 0.70710677, %v1962_v29  ;;  %v1923_v37 = vadd.f32 %v1922_v54, %v1709_v22  ;;  %v1966_v38 = vadd.f32 %v1965_v58, %v1717_v4 }
 0xa75   : > { %3266 = verf.f32 %v1976_v33  ;;  %v1980_v39 = vmul.f32 0.70710677, %v1921_v57  ;;  %v1982_v40 = vmul.f32 0.70710677, %v1964_v36  ;;  %v1968_v50 = vmul.f32 0.5, %v1917_v24 }
 0xa76   : > { %3268 = verf.f32 %v1978_v34  ;;  %v1981_v42 = vmul.f32 0.70710677, %v1923_v37  ;;  %v1983_v43 = vmul.f32 0.70710677, %v1966_v38  ;;  %v1970_v51 = vmul.f32 0.5, %v1960_v25 }
 0xa77   : > { %3270 = verf.f32 %v1977_v55  ;;  %v1969_v59 = vmul.f32 0.5, %v1919_v28  ;;  %v1972_v61 = vmul.f32 0.5, %v1921_v57  ;;  %v1971_v0 = vmul.f32 0.5, %v1962_v29 }
 0xa78   : > { %3272 = verf.f32 %v1979_v35  ;;  %v1974_v53 = vmul.f32 0.5, %v1964_v36  ;;  %v1973_v7 = vmul.f32 0.5, %v1923_v37  ;;  %v1975_v11 = vmul.f32 0.5, %v1966_v38 }
 0xa79   : > { %3274 = verf.f32 %v1980_v39 }
 0xa7a   : > { %3276 = verf.f32 %v1982_v40 }
 0xa7b   : > { %3278 = verf.f32 %v1981_v42 }
 0xa7c   : > { %3280 = verf.f32 %v1983_v43 }
 0xa7f   : > { %v3267_v44 = vpop.eup %3266 }
 0xa80   : > { %v3269_v46 = vpop.eup %3268  ;;  %v1992_v48 = vadd.f32 1.0, %v3267_v44 }
 0xa81   : > { %v3271_v47 = vpop.eup %3270  ;;  %v1994_v52 = vadd.f32 1.0, %v3269_v46 }
 0xa82   : > { %v3273_v30 = vpop.eup %3272  ;;  %v1993_v60 = vadd.f32 1.0, %v3271_v47  ;;  %v2000_v5 = vmul.f32 %v1992_v48, %v1968_v50 }
 0xa83   : > { %v3275_v49 = vpop.eup %3274  ;;  %v1995_v1 = vadd.f32 1.0, %v3273_v30  ;;  %v2002_v9 = vmul.f32 %v1994_v52, %v1970_v51 }
 0xa84   : > { %v3277_v56 = vpop.eup %3276  ;;  %v1996_v62 = vadd.f32 1.0, %v3275_v49  ;;  %v2001_v13 = vmul.f32 %v1993_v60, %v1969_v59 }
 0xa85   : > { %v3279_v63 = vpop.eup %3278  ;;  %v1998_v2 = vadd.f32 1.0, %v3277_v56  ;;  %v2003_v17 = vmul.f32 %v1995_v1, %v1971_v0 }
 0xa86   : > { %v3281_v3 = vpop.eup %3280  ;;  %v2004_v6 = vmul.f32 %v1996_v62, %v1972_v61  ;;  %v1997_v8 = vadd.f32 1.0, %v3279_v63 }
 0xa87   : > { %v2006_v10 = vmul.f32 %v1998_v2, %v1974_v53  ;;  %v1999_v12 = vadd.f32 1.0, %v3281_v3 }
 0xa88   : > { %v2008_v14 = vpack.c.bf16 %v2004_v6, %v2000_v5  ;;  %v2005_v15 = vmul.f32 %v1997_v8, %v1973_v7 }
 0xa89   : > { %v2010_v18 = vpack.c.bf16 %v2006_v10, %v2002_v9  ;;  %v2007_v19 = vmul.f32 %v1999_v12, %v1975_v11 }
 0xa8a   : > { %v2009_v20 = vpack.c.bf16 %v2005_v15, %v2001_v13 }
 0xa8b   : > { %v2011_v21 = vpack.c.bf16 %v2007_v19, %v2003_v17 }
 0xa8c   : > { %2307 = vmatprep.mubr.bf16.mxu1 %v2009_v20 }
 0xa8d   : > { %2348 = vmatprep.mubr.bf16.mxu0 %v2011_v21  ;;  %2308 = vmatmul.mubr.bf16.vlgmr.msra.gmra.mrb[32].mxu1 %v2008_v14 }
 0xa8e   : > { %2349 = vmatmul.mubr.bf16.vlgmr.msra.gmra.mrb[20].mxu0 %v2010_v18 }
 0xb60   : > { %v2762_v22 = vpop.f32.mrb[32].mxu1 }
 0xb61   : > { %v2784_v4 = vpop.f32.mrb[20].mxu0  ;;  %v2763_v16 = vpop.f32.mrb[33].mxu1 }
 0xb62   : > { %v2764_v24 = vadd.f32 %v2763_v16, %v2762_v22  ;;  %v2785_v25 = vpop.f32.mrb[21].mxu0  ;;  %v2765_v26 = vpop.f32.mrb[34].mxu1 }
 0xb63   : > { %v2786_v27 = vadd.f32 %v2785_v25, %v2784_v4  ;;  %v2787_v28 = vpop.f32.mrb[22].mxu0  ;;  %v2766_v29 = vpop.f32.mrb[35].mxu1 }
 0xb64   : > { %v2310_v31 = vadd.f32 %v2764_v24, %v2672_v23  ;;  %v2767_v32 = vadd.f32 %v2766_v29, %v2765_v26  ;;  %v2788_v33 = vpop.f32.mrb[23].mxu0 }
 0xb65   : > { %v2789_v34 = vadd.f32 %v2788_v33, %v2787_v28 }
 0xb66   : > { %v2351_v55 = vadd.f32 %v2786_v27, %v2310_v31  ;;  %v2313_v35 = vadd.f32 %v2767_v32, %v2672_v23 }
 0xb68   : > { %v2357_v57 = vadd.f32 %v2351_v55, %v4389_v41  ;;  %v2354_v36 = vadd.f32 %v2789_v34, %v2313_v35 }
 0xb6a   : > { %2359 = vst [vmem:[%s616_s13] sm:$0xff] %v2357_v57  ;;  %v2358_v54 = vadd.f32 %v2354_v36, %v4392_v45 }
 0xb6c   : > { %2360 = vst [vmem:[%s616_s13 + $0x8] sm:$0xff] %v2358_v54 }
 0xb6d   : > { %3663 = shalt.err (!%p3660_p7)
}
 0xb6e   : > { %s3664_s13 = scalar_lea.hbm %s4424_s25, 256  ;;  %s3668_s17 = scalar_lea.hbm %s4532_s16, 512 }
 0xb6f   : > { %p3665_p6 = scmp.ne.s32.totalorder %s4424_s25, %s3664_s13  ;;  %p3669_p13 = scmp.lt.u32.totalorder %s4424_s25, %s4532_s16 }
 0xb70   : > { %p3670_p1 = scmp.lt.u32.totalorder %s3668_s17, %s3664_s13  ;;  %p3672_p2 = scmp.lt.u32.totalorder %s3664_s13, %s4424_s25 }
 0xb71   : > { %p3666_p9 = pnand %p3665_p6, %p4533_p8 }
 0xb72   : > { %p3671_p3 = por %p3670_p1, %p3669_p13 }
 0xb73   : > { %p3667_p4 = pneg %p3666_p9 }
 0xb74   : > { %p3673_p10 = por %p3672_p2, %p3671_p3 }
 0xb76   : > { %p3674_p11 = pnand %p3673_p10, %p3667_p4 }
 0xb78   : > { %3677 = shalt.err (!%p3674_p11)
}
 0xb79   : > { %s3770_s1 = smov 128   ;;  %s3771_s30 = smov 8  }
 0xb7a   : > { %2928 = dma.vmem_to_hbm [thread:$0]  (%p4533_p8), %s4419_s19, 256, %s4424_s25, %s2362_s21, %s3770_s1, %s3770_s1, %s3771_s30  }
 0xb7b PF: > { %s4534_s14 = sld [smem:[#allocation32_spill]]  ;;  %p4535_p12 = scmp.ne.s32.totalorder %s4514_s23, 0 }
 0xb7c   : > { %p4536_p0 = scmp.ge.s32.totalorder %s3740_s28, 2 }
 0xb7e   : > { %p2972_p5 = pnand %p4536_p0, %p4535_p12 }
 0xb81   : > { %s2390_s20 = sand.u32 1, %s4534_s14  }
 0xb82   : > { %s2391_s13 = scalar_lea.sflag [#allocation4], %s2390_s20 }
 0xb83   : > { %3723 = dma.done.wait (!%p2972_p5), %s2391_s13, 256  }
 0xb84   : > { %3725 = vsyncadd (!%p2972_p5), %s2391_s13, 4294967040  ;;  %p32_p7 = scmp.ge.s32.totalorder %s4133_s18, 4   ;;  %s4537_s25 = smov %s3732_s26 }
 0xb85   : > { %s4538_s26 = smov %s3736_s27  ;;  %s4539_s27 = smov %s4144_s29 }
 0xb86   : > { %s4540_s28 = smov %s4133_s18  ;;  %34 = sbr.rel (!%p32_p7) target bundleno = 16 (0x10), region = 165 }
 0xb8d   :  { %2396 = vsyncpa [#allocation3], 1 }
 0xb8e   :  { %2398 = vsyncpa [#allocation3 + $0x1], 1 }
 0xb8f   :  { %2399 = vsyncpa [#allocation6], 1 }
 0xb90   :  { %2400 = vsyncpa [#allocation9], 1 }
 0xb91   :  { %2401 = vsyncpa [#allocation12], 1 }
 0xb92   :  { %2402 = vsyncpa [#allocation15], 1 }
 0xb93   :  { %2403 = vsyncpa [#allocation18], 1 }
 0xb94   :  { %2404 = vsyncpa [#allocation21], 1 }
 0xb95   :  { %2405 = vsyncpa [#allocation4], 1 }
 0xb96   :  { %2407 = vsyncpa [#allocation4 + $0x1], 1 }

</bundles_post_ra>
